<compile_context>
chip_gen: v7x
topology: tpu7x:2x2x1
jax: 0.10.0
libtpu: 0.0.40
codegen_flags: <defaults>
</compile_context>

<pallas_src>
import functools

import jax
import jax.numpy as jnp
from jax.experimental import pallas as pl
from jax.experimental.pallas import tpu as pltpu


# ---------------------------------------------------------------------------
# Fused Pallas kernel: QKV projection + per-head attention + output projection
# ---------------------------------------------------------------------------
def _mhsa_fused_kernel(H, Dh, T, T_pad, TQ,
                       x_ref, wq_ref, wkv_ref, w0_ref,
                       y_ref, kv_ref, o_ref):
    # x_ref  : (1, T_pad, dim) bf16  -- full padded sequence (resident per batch)
    # wq_ref : (dim, H*Dh)     bf16  -- W_q^T with softmax scale folded in
    # wkv_ref: (dim, 2*H*Dh)   bf16  -- [W_k | W_v]^T fused
    # w0_ref : (H*Dh, dim)     bf16  -- W_0^T
    # y_ref  : (1, TQ, dim)          -- final output tile
    # kv_ref : (T_pad, 2*H*Dh) bf16  VMEM scratch, carried across q-tiles
    # o_ref  : (TQ, H*Dh)      bf16  VMEM scratch, concatenated head outputs
    qi = pl.program_id(1)
    HD = H * Dh

    # ---- K/V projection for the whole sequence, once per batch element ----
    @pl.when(qi == 0)
    def _():
        kv = jnp.dot(x_ref[0], wkv_ref[...],
                     preferred_element_type=jnp.float32)         # (T_pad, 2HD)
        kv_ref[...] = kv.astype(jnp.bfloat16)

    # ---- Q projection for this query tile (scale pre-folded into wq) -------
    q_start = pl.multiple_of(qi * TQ, TQ)                        # TQ % 8 == 0
    xq = x_ref[0, pl.ds(q_start, TQ), :]                         # (TQ, dim)
    q = jnp.dot(xq, wq_ref[...],
                preferred_element_type=jnp.float32).astype(jnp.bfloat16)

    # Additive bias masking padded key columns (compile-time constant).
    if T_pad > T:
        key_idx = jax.lax.broadcasted_iota(jnp.int32, (1, T_pad), 1)
        bias = jnp.where(key_idx < T, 0.0, -1e30).astype(jnp.float32)
    else:
        bias = None

    # ---- per-head softmax attention -----------------------------------------
    for h in range(H):                                           # static unroll
        qh = q[:, h * Dh:(h + 1) * Dh]                           # (TQ, Dh) bf16
        kh = kv_ref[:, h * Dh:(h + 1) * Dh]                      # (T_pad, Dh)
        vh = kv_ref[:, HD + h * Dh: HD + (h + 1) * Dh]           # (T_pad, Dh)

        s = jax.lax.dot_general(qh, kh, (((1,), (1,)), ((), ())),
                                preferred_element_type=jnp.float32)  # (TQ, T_pad)
        if bias is not None:
            s = s + bias

        m = jnp.max(s, axis=-1, keepdims=True)                   # f32
        p = jnp.exp(s - m)                                       # f32
        l = jnp.sum(p, axis=-1, keepdims=True)                   # f32 (TQ, 1)

        o = jnp.dot(p.astype(jnp.bfloat16), vh,
                    preferred_element_type=jnp.float32)          # (TQ, Dh) f32
        o = o * pl.reciprocal(l, approx=True)                    # normalize on EUP
        o_ref[:, h * Dh:(h + 1) * Dh] = o.astype(jnp.bfloat16)   # lane-dense store

    # ---- fused output projection (kernel emits y directly) ------------------
    y = jnp.dot(o_ref[...], w0_ref[...], preferred_element_type=jnp.float32)
    y_ref[0] = y.astype(y_ref.dtype)


# ---------------------------------------------------------------------------
# Wrapper
# ---------------------------------------------------------------------------
def multi_head_self_attention(x, w_qkv, w_0, heads, dim_head, *, block_q=None):
    """x: (B, T, dim); w_qkv: (3*heads*dim_head, dim); w_0: (dim, heads*dim_head)."""
    B, T, dim = x.shape
    H, Dh = heads, dim_head
    HD = H * Dh
    scale = float(Dh) ** -0.5

    # --- query-tile choice: multiple of 8, capped at 128 --------------------
    T8 = ((T + 7) // 8) * 8
    TQ = min(T8, 128) if block_q is None else block_q
    TQ = max(8, min(((TQ + 7) // 8) * 8, T8))
    T_pad = ((T + TQ - 1) // TQ) * TQ
    QT = T_pad // TQ

    # --- weight rearrangement (pure-JAX glue, done once per call) -----------
    # columns of w_qkv.T follow 'b t (d k h)': idx = d*3H + k*H + h.
    wt = w_qkv.T.reshape(dim, Dh, 3, H)                          # (dim, d, k, h)

    def _pick(kidx):  # -> (dim, H*Dh) with column order (h, d)
        return jnp.transpose(wt[:, :, kidx, :], (0, 2, 1)).reshape(dim, HD)

    w_q_t = (_pick(0) * scale).astype(jnp.bfloat16)              # scale folded in
    w_kv_t = jnp.concatenate([_pick(1), _pick(2)], axis=1).astype(jnp.bfloat16)
    w0_t = w_0.T.astype(jnp.bfloat16)                            # (HD, dim)

    x_bf = x.astype(jnp.bfloat16)
    if T_pad > T:
        x_bf = jnp.pad(x_bf, ((0, 0), (0, T_pad - T), (0, 0)))

    # --- VMEM budget from actual buffer sizes --------------------------------
    out_itemsize = jnp.dtype(x.dtype).itemsize
    needed = (2 * T_pad * dim * 2                    # x block (double-buffered)
              + (dim * HD + dim * 2 * HD + HD * dim) * 2   # weights (single buf)
              + 2 * TQ * dim * out_itemsize          # y block (double-buffered)
              + T_pad * 2 * HD * 2                   # kv scratch
              + TQ * HD * 2                          # o scratch
              + 2 * TQ * T_pad * 4                   # f32 score/exp slabs
              + TQ * HD * 4                          # f32 q
              + (4 << 20))                           # headroom
    try:
        vmem_cap = pltpu.get_tpu_info().vmem_capacity_bytes
    except Exception:
        vmem_cap = 64 * 1024 * 1024                  # conservative (v7x)
    vmem_limit = int(min(max(needed, 32 * 1024 * 1024), vmem_cap * 3 // 4))

    kernel = functools.partial(_mhsa_fused_kernel, H, Dh, T, T_pad, TQ)

    def _call(single_buffer_weights):
        if single_buffer_weights:
            def w_spec(shape):
                return pl.BlockSpec(shape, lambda b, qi: (0, 0),
                                    pipeline_mode=pl.Buffered(1))
        else:
            def w_spec(shape):
                return pl.BlockSpec(shape, lambda b, qi: (0, 0))

        return pl.pallas_call(
            kernel,
            out_shape=jax.ShapeDtypeStruct((B, T_pad, dim), x.dtype),
            grid_spec=pltpu.PrefetchScalarGridSpec(
                num_scalar_prefetch=0,
                grid=(B, QT),
                in_specs=[
                    pl.BlockSpec((1, T_pad, dim), lambda b, qi: (b, 0, 0)),  # x
                    w_spec((dim, HD)),            # W_q^T (pre-scaled)
                    w_spec((dim, 2 * HD)),        # [W_k | W_v]^T
                    w_spec((HD, dim)),            # W_0^T
                ],
                out_specs=pl.BlockSpec((1, TQ, dim), lambda b, qi: (b, qi, 0)),
                scratch_shapes=[pltpu.VMEM((T_pad, 2 * HD), jnp.bfloat16),
                                pltpu.VMEM((TQ, HD), jnp.bfloat16)],
            ),
            compiler_params=pltpu.CompilerParams(
                dimension_semantics=("parallel", "arbitrary"),
                vmem_limit_bytes=vmem_limit,
            ),
        )(x_bf, w_q_t, w_kv_t, w0_t)

    try:
        y_full = _call(True)
    except Exception:
        # Fallback if this JAX build rejects pipeline_mode=pl.Buffered(1) for
        # constant-index weight blocks (it is purely a VMEM-usage optimization).
        y_full = _call(False)

    return y_full[:, :T, :] if T_pad > T else y_full


# ---------------------------------------------------------------------------
# Pure-JAX reference (mirrors the PyTorch forward) for correctness checks.
# ---------------------------------------------------------------------------
def reference_mhsa(x, w_qkv, w_0, heads, dim_head):
    B, T, dim = x.shape
    H, Dh = heads, dim_head
    qkv = x @ w_qkv.T                                    # (B, T, 3*H*Dh)
    qkv = qkv.reshape(B, T, Dh, 3, H)                    # 'b t (d k h)'
    qkv = jnp.transpose(qkv, (3, 0, 4, 1, 2))            # 'k b h t d'
    q, k, v = qkv[0], qkv[1], qkv[2]
    s = jnp.einsum('bhid,bhjd->bhij', q, k) * (Dh ** -0.5)
    a = jax.nn.softmax(s, axis=-1)
    o = jnp.einsum('bhij,bhjd->bhid', a, v)
    o = jnp.transpose(o, (0, 2, 1, 3)).reshape(B, T, H * Dh)
    return o @ w_0.T


def _make_params(key, dim, heads, dim_head):
    _dim = heads * dim_head
    kw1, kw2 = jax.random.split(key)
    bound1 = 1.0 / (dim ** 0.5)
    w_qkv = jax.random.uniform(kw1, (3 * _dim, dim), jnp.float32, -bound1, bound1)
    bound2 = 1.0 / (_dim ** 0.5)
    w_0 = jax.random.uniform(kw2, (dim, _dim), jnp.float32, -bound2, bound2)
    return w_qkv, w_0


if __name__ == "__main__":
    key = jax.random.PRNGKey(0)
    k1, k2, k3, k4 = jax.random.split(key, 4)

    # --- case 1: module defaults (dim=32, heads=8 -> dim_head=4), single q tile
    B, T, dim, heads = 2, 8, 32, 8
    dim_head = dim // heads
    x = jax.random.normal(k1, (B, T, dim), dtype=jnp.float32)
    w_qkv, w_0 = _make_params(k2, dim, heads, dim_head)

    y = multi_head_self_attention(x, w_qkv, w_0, heads, dim_head)
    y = jax.block_until_ready(y)
    y_ref = reference_mhsa(x, w_qkv, w_0, heads, dim_head)
    assert y.shape == (B, T, dim)
    # bf16 MXU operands -> looser tolerance than pure-f32.
    assert jnp.allclose(y, y_ref, atol=3e-2, rtol=3e-2), "case 1 mismatch"

    # --- case 2: multiple q tiles + T padding/masking (T=12 with block_q=8)
    B2, T2, dim2, heads2, dim_head2 = 1, 12, 32, 4, 8
    x2 = jax.random.normal(k3, (B2, T2, dim2), dtype=jnp.float32)
    w_qkv2, w_02 = _make_params(k4, dim2, heads2, dim_head2)

    y2 = multi_head_self_attention(x2, w_qkv2, w_02, heads2, dim_head2, block_q=8)
    y2 = jax.block_until_ready(y2)
    y2_ref = reference_mhsa(x2, w_qkv2, w_02, heads2, dim_head2)
    assert y2.shape == (B2, T2, dim2)
    assert jnp.allclose(y2, y2_ref, atol=3e-2, rtol=3e-2), "case 2 mismatch"

    print("KERNEL_OK")
</pallas_src>

<mosaic_0001>
module attributes {stable_mosaic.version = 11 : i64} {
  func.func @_mhsa_fused_kernel(%arg0: i32, %arg1: i32, %arg2: memref<1x8x32xbf16, #tpu.memory_space<vmem>>, %arg3: memref<32x32xbf16, #tpu.memory_space<vmem>>, %arg4: memref<32x64xbf16, #tpu.memory_space<vmem>>, %arg5: memref<32x32xbf16, #tpu.memory_space<vmem>>, %arg6: memref<1x8x32xf32, #tpu.memory_space<vmem>>, %arg7: memref<8x64xbf16, #tpu.memory_space<vmem>>, %arg8: memref<8x32xbf16, #tpu.memory_space<vmem>>) attributes {dimension_semantics = [#tpu.dimension_semantics<parallel>, #tpu.dimension_semantics<arbitrary>], iteration_bounds = array<i64: 2, 1>, scalar_prefetch = 0 : i64, scratch_operands = 2 : i64, tpu.core_type = #tpu.core_type<tc>, window_params = [{transform_indices = @transform_0, window_bounds = array<i64: 1, 8, 32>}, {pipeline_mode = #tpu.pipeline_mode<synchronous>, transform_indices = @transform_1, window_bounds = array<i64: 32, 32>}, {pipeline_mode = #tpu.pipeline_mode<synchronous>, transform_indices = @transform_2, window_bounds = array<i64: 32, 64>}, {pipeline_mode = #tpu.pipeline_mode<synchronous>, transform_indices = @transform_3, window_bounds = array<i64: 32, 32>}, {transform_indices = @transform_4, window_bounds = array<i64: 1, 8, 32>}]} {
    %c0_i32 = arith.constant 0 : i32
    %0 = arith.cmpi eq, %arg1, %c0_i32 : i32
    %1 = arith.extui %0 : i1 to i32
    %c0_i32_0 = arith.constant 0 : i32
    %2 = arith.cmpi ne, %1, %c0_i32_0 : i32
    scf.if %2 {
      %c0_77 = arith.constant 0 : index
      %c0_78 = arith.constant 0 : index
      %c0_79 = arith.constant 0 : index
      %161 = vector.load %arg2[%c0_77, %c0_78, %c0_79] : memref<1x8x32xbf16, #tpu.memory_space<vmem>>, vector<1x8x32xbf16>
      %162 = vector.shape_cast %161 : vector<1x8x32xbf16> to vector<8x32xbf16>
      %c0_80 = arith.constant 0 : index
      %c0_81 = arith.constant 0 : index
      %163 = vector.load %arg4[%c0_80, %c0_81] : memref<32x64xbf16, #tpu.memory_space<vmem>>, vector<32x64xbf16>
      %cst_82 = arith.constant dense<0.000000e+00> : vector<8x64xf32>
      %164 = tpu.matmul %162, %163, %cst_82 {dimension_numbers = #tpu.dot_dimension_numbers<[1], [0], [0], [1], [0, 0, 1, 1], [], []>} : vector<8x32xbf16>, vector<32x64xbf16>, vector<8x64xf32> -> vector<8x64xf32>
      %165 = arith.truncf %164 : vector<8x64xf32> to vector<8x64xbf16>
      %c0_83 = arith.constant 0 : index
      %c0_84 = arith.constant 0 : index
      %166 = vector.load %arg7[%c0_83, %c0_84] : memref<8x64xbf16, #tpu.memory_space<vmem>>, vector<8x64xbf16>
      tpu.vector_store %arg7[%c0_83, %c0_84], %165 {strides = array<i32>} : memref<8x64xbf16, #tpu.memory_space<vmem>>, vector<8x64xbf16>,
    } else {
    }
    %c8_i32 = arith.constant 8 : i32
    %3 = arith.muli %arg1, %c8_i32 : i32
    %4 = tpu.assume_multiple %3, 8 : i32
    %c0 = arith.constant 0 : index
    %5 = arith.index_cast %4 : i32 to index
    %c0_1 = arith.constant 0 : index
    %6 = vector.load %arg2[%c0, %5, %c0_1] : memref<1x8x32xbf16, #tpu.memory_space<vmem>>, vector<1x8x32xbf16>
    %7 = vector.shape_cast %6 : vector<1x8x32xbf16> to vector<8x32xbf16>
    %c0_2 = arith.constant 0 : index
    %c0_3 = arith.constant 0 : index
    %8 = vector.load %arg3[%c0_2, %c0_3] : memref<32x32xbf16, #tpu.memory_space<vmem>>, vector<32x32xbf16>
    %cst = arith.constant dense<0.000000e+00> : vector<8x32xf32>
    %9 = tpu.matmul %7, %8, %cst {dimension_numbers = #tpu.dot_dimension_numbers<[1], [0], [0], [1], [0, 0, 1, 1], [], []>} : vector<8x32xbf16>, vector<32x32xbf16>, vector<8x32xf32> -> vector<8x32xf32>
    %10 = arith.truncf %9 : vector<8x32xf32> to vector<8x32xbf16>
    %11 = vector.extract_strided_slice %10 {offsets = [0, 0], sizes = [8, 4], strides = [1, 1]} : vector<8x32xbf16> to vector<8x4xbf16>
    %c0_4 = arith.constant 0 : index
    %c0_5 = arith.constant 0 : index
    %12 = vector.load %arg7[%c0_4, %c0_5] : memref<8x64xbf16, #tpu.memory_space<vmem>>, vector<8x4xbf16>
    %c0_6 = arith.constant 0 : index
    %c32 = arith.constant 32 : index
    %13 = vector.load %arg7[%c0_6, %c32] : memref<8x64xbf16, #tpu.memory_space<vmem>>, vector<8x4xbf16>
    %cst_7 = arith.constant dense<0.000000e+00> : vector<8x8xf32>
    %14 = tpu.matmul %11, %12, %cst_7 {dimension_numbers = #tpu.dot_dimension_numbers<[1], [1], [0], [0], [0, 0, 1, 0], [], []>} : vector<8x4xbf16>, vector<8x4xbf16>, vector<8x8xf32> -> vector<8x8xf32>
    %cst_8 = arith.constant dense<0xFF800000> : vector<8xf32>
    %15 = vector.multi_reduction <maximumf>, %14, %cst_8 [1] : vector<8x8xf32> to vector<8xf32>
    %16 = vector.shape_cast %15 : vector<8xf32> to vector<8x1xf32>
    %17 = vector.broadcast %16 : vector<8x1xf32> to vector<8x8xf32>
    %18 = arith.subf %14, %17 : vector<8x8xf32>
    %19 = math.exp %18 : vector<8x8xf32>
    %cst_9 = arith.constant dense<0.000000e+00> : vector<8xf32>
    %20 = vector.multi_reduction <add>, %19, %cst_9 [1] : vector<8x8xf32> to vector<8xf32>
    %21 = vector.shape_cast %20 : vector<8xf32> to vector<8x1xf32>
    %22 = arith.truncf %19 : vector<8x8xf32> to vector<8x8xbf16>
    %cst_10 = arith.constant dense<0.000000e+00> : vector<8x4xf32>
    %23 = tpu.matmul %22, %13, %cst_10 {dimension_numbers = #tpu.dot_dimension_numbers<[1], [0], [0], [1], [0, 0, 1, 1], [], []>} : vector<8x8xbf16>, vector<8x4xbf16>, vector<8x4xf32> -> vector<8x4xf32>
    %24 = tpu.reciprocal %21 {approx = true} : vector<8x1xf32> -> vector<8x1xf32>
    %25 = vector.broadcast %24 : vector<8x1xf32> to vector<8x4xf32>
    %26 = arith.mulf %23, %25 : vector<8x4xf32>
    %27 = arith.truncf %26 : vector<8x4xf32> to vector<8x4xbf16>
    %c0_11 = arith.constant 0 : index
    %c0_12 = arith.constant 0 : index
    %28 = vector.load %arg8[%c0_11, %c0_12] : memref<8x32xbf16, #tpu.memory_space<vmem>>, vector<8x4xbf16>
    tpu.vector_store %arg8[%c0_11, %c0_12], %27 {strides = array<i32>} : memref<8x32xbf16, #tpu.memory_space<vmem>>, vector<8x4xbf16>,
    %29 = vector.extract_strided_slice %10 {offsets = [0, 4], sizes = [8, 4], strides = [1, 1]} : vector<8x32xbf16> to vector<8x4xbf16>
    %c0_13 = arith.constant 0 : index
    %c4 = arith.constant 4 : index
    %30 = vector.load %arg7[%c0_13, %c4] : memref<8x64xbf16, #tpu.memory_space<vmem>>, vector<8x4xbf16>
    %c0_14 = arith.constant 0 : index
    %c36 = arith.constant 36 : index
    %31 = vector.load %arg7[%c0_14, %c36] : memref<8x64xbf16, #tpu.memory_space<vmem>>, vector<8x4xbf16>
    %cst_15 = arith.constant dense<0.000000e+00> : vector<8x8xf32>
    %32 = tpu.matmul %29, %30, %cst_15 {dimension_numbers = #tpu.dot_dimension_numbers<[1], [1], [0], [0], [0, 0, 1, 0], [], []>} : vector<8x4xbf16>, vector<8x4xbf16>, vector<8x8xf32> -> vector<8x8xf32>
    %cst_16 = arith.constant dense<0xFF800000> : vector<8xf32>
    %33 = vector.multi_reduction <maximumf>, %32, %cst_16 [1] : vector<8x8xf32> to vector<8xf32>
    %34 = vector.shape_cast %33 : vector<8xf32> to vector<8x1xf32>
    %35 = vector.broadcast %34 : vector<8x1xf32> to vector<8x8xf32>
    %36 = arith.subf %32, %35 : vector<8x8xf32>
    %37 = math.exp %36 : vector<8x8xf32>
    %cst_17 = arith.constant dense<0.000000e+00> : vector<8xf32>
    %38 = vector.multi_reduction <add>, %37, %cst_17 [1] : vector<8x8xf32> to vector<8xf32>
    %39 = vector.shape_cast %38 : vector<8xf32> to vector<8x1xf32>
    %40 = arith.truncf %37 : vector<8x8xf32> to vector<8x8xbf16>
    %cst_18 = arith.constant dense<0.000000e+00> : vector<8x4xf32>
    %41 = tpu.matmul %40, %31, %cst_18 {dimension_numbers = #tpu.dot_dimension_numbers<[1], [0], [0], [1], [0, 0, 1, 1], [], []>} : vector<8x8xbf16>, vector<8x4xbf16>, vector<8x4xf32> -> vector<8x4xf32>
    %42 = tpu.reciprocal %39 {approx = true} : vector<8x1xf32> -> vector<8x1xf32>
    %43 = vector.broadcast %42 : vector<8x1xf32> to vector<8x4xf32>
    %44 = arith.mulf %41, %43 : vector<8x4xf32>
    %45 = arith.truncf %44 : vector<8x4xf32> to vector<8x4xbf16>
    %c0_19 = arith.constant 0 : index
    %c4_20 = arith.constant 4 : index
    %46 = vector.load %arg8[%c0_19, %c4_20] : memref<8x32xbf16, #tpu.memory_space<vmem>>, vector<8x4xbf16>
    tpu.vector_store %arg8[%c0_19, %c4_20], %45 {strides = array<i32>} : memref<8x32xbf16, #tpu.memory_space<vmem>>, vector<8x4xbf16>,
    %47 = vector.extract_strided_slice %10 {offsets = [0, 8], sizes = [8, 4], strides = [1, 1]} : vector<8x32xbf16> to vector<8x4xbf16>
    %c0_21 = arith.constant 0 : index
    %c8 = arith.constant 8 : index
    %48 = vector.load %arg7[%c0_21, %c8] : memref<8x64xbf16, #tpu.memory_space<vmem>>, vector<8x4xbf16>
    %c0_22 = arith.constant 0 : index
    %c40 = arith.constant 40 : index
    %49 = vector.load %arg7[%c0_22, %c40] : memref<8x64xbf16, #tpu.memory_space<vmem>>, vector<8x4xbf16>
    %cst_23 = arith.constant dense<0.000000e+00> : vector<8x8xf32>
    %50 = tpu.matmul %47, %48, %cst_23 {dimension_numbers = #tpu.dot_dimension_numbers<[1], [1], [0], [0], [0, 0, 1, 0], [], []>} : vector<8x4xbf16>, vector<8x4xbf16>, vector<8x8xf32> -> vector<8x8xf32>
    %cst_24 = arith.constant dense<0xFF800000> : vector<8xf32>
    %51 = vector.multi_reduction <maximumf>, %50, %cst_24 [1] : vector<8x8xf32> to vector<8xf32>
    %52 = vector.shape_cast %51 : vector<8xf32> to vector<8x1xf32>
    %53 = vector.broadcast %52 : vector<8x1xf32> to vector<8x8xf32>
    %54 = arith.subf %50, %53 : vector<8x8xf32>
    %55 = math.exp %54 : vector<8x8xf32>
    %cst_25 = arith.constant dense<0.000000e+00> : vector<8xf32>
    %56 = vector.multi_reduction <add>, %55, %cst_25 [1] : vector<8x8xf32> to vector<8xf32>
    %57 = vector.shape_cast %56 : vector<8xf32> to vector<8x1xf32>
    %58 = arith.truncf %55 : vector<8x8xf32> to vector<8x8xbf16>
    %cst_26 = arith.constant dense<0.000000e+00> : vector<8x4xf32>
    %59 = tpu.matmul %58, %49, %cst_26 {dimension_numbers = #tpu.dot_dimension_numbers<[1], [0], [0], [1], [0, 0, 1, 1], [], []>} : vector<8x8xbf16>, vector<8x4xbf16>, vector<8x4xf32> -> vector<8x4xf32>
    %60 = tpu.reciprocal %57 {approx = true} : vector<8x1xf32> -> vector<8x1xf32>
    %61 = vector.broadcast %60 : vector<8x1xf32> to vector<8x4xf32>
    %62 = arith.mulf %59, %61 : vector<8x4xf32>
    %63 = arith.truncf %62 : vector<8x4xf32> to vector<8x4xbf16>
    %c0_27 = arith.constant 0 : index
    %c8_28 = arith.constant 8 : index
    %64 = vector.load %arg8[%c0_27, %c8_28] : memref<8x32xbf16, #tpu.memory_space<vmem>>, vector<8x4xbf16>
    tpu.vector_store %arg8[%c0_27, %c8_28], %63 {strides = array<i32>} : memref<8x32xbf16, #tpu.memory_space<vmem>>, vector<8x4xbf16>,
    %65 = vector.extract_strided_slice %10 {offsets = [0, 12], sizes = [8, 4], strides = [1, 1]} : vector<8x32xbf16> to vector<8x4xbf16>
    %c0_29 = arith.constant 0 : index
    %c12 = arith.constant 12 : index
    %66 = vector.load %arg7[%c0_29, %c12] : memref<8x64xbf16, #tpu.memory_space<vmem>>, vector<8x4xbf16>
    %c0_30 = arith.constant 0 : index
    %c44 = arith.constant 44 : index
    %67 = vector.load %arg7[%c0_30, %c44] : memref<8x64xbf16, #tpu.memory_space<vmem>>, vector<8x4xbf16>
    %cst_31 = arith.constant dense<0.000000e+00> : vector<8x8xf32>
    %68 = tpu.matmul %65, %66, %cst_31 {dimension_numbers = #tpu.dot_dimension_numbers<[1], [1], [0], [0], [0, 0, 1, 0], [], []>} : vector<8x4xbf16>, vector<8x4xbf16>, vector<8x8xf32> -> vector<8x8xf32>
    %cst_32 = arith.constant dense<0xFF800000> : vector<8xf32>
    %69 = vector.multi_reduction <maximumf>, %68, %cst_32 [1] : vector<8x8xf32> to vector<8xf32>
    %70 = vector.shape_cast %69 : vector<8xf32> to vector<8x1xf32>
    %71 = vector.broadcast %70 : vector<8x1xf32> to vector<8x8xf32>
    %72 = arith.subf %68, %71 : vector<8x8xf32>
    %73 = math.exp %72 : vector<8x8xf32>
    %cst_33 = arith.constant dense<0.000000e+00> : vector<8xf32>
    %74 = vector.multi_reduction <add>, %73, %cst_33 [1] : vector<8x8xf32> to vector<8xf32>
    %75 = vector.shape_cast %74 : vector<8xf32> to vector<8x1xf32>
    %76 = arith.truncf %73 : vector<8x8xf32> to vector<8x8xbf16>
    %cst_34 = arith.constant dense<0.000000e+00> : vector<8x4xf32>
    %77 = tpu.matmul %76, %67, %cst_34 {dimension_numbers = #tpu.dot_dimension_numbers<[1], [0], [0], [1], [0, 0, 1, 1], [], []>} : vector<8x8xbf16>, vector<8x4xbf16>, vector<8x4xf32> -> vector<8x4xf32>
    %78 = tpu.reciprocal %75 {approx = true} : vector<8x1xf32> -> vector<8x1xf32>
    %79 = vector.broadcast %78 : vector<8x1xf32> to vector<8x4xf32>
    %80 = arith.mulf %77, %79 : vector<8x4xf32>
    %81 = arith.truncf %80 : vector<8x4xf32> to vector<8x4xbf16>
    %c0_35 = arith.constant 0 : index
    %c12_36 = arith.constant 12 : index
    %82 = vector.load %arg8[%c0_35, %c12_36] : memref<8x32xbf16, #tpu.memory_space<vmem>>, vector<8x4xbf16>
    tpu.vector_store %arg8[%c0_35, %c12_36], %81 {strides = array<i32>} : memref<8x32xbf16, #tpu.memory_space<vmem>>, vector<8x4xbf16>,
    %83 = vector.extract_strided_slice %10 {offsets = [0, 16], sizes = [8, 4], strides = [1, 1]} : vector<8x32xbf16> to vector<8x4xbf16>
    %c0_37 = arith.constant 0 : index
    %c16 = arith.constant 16 : index
    %84 = vector.load %arg7[%c0_37, %c16] : memref<8x64xbf16, #tpu.memory_space<vmem>>, vector<8x4xbf16>
    %c0_38 = arith.constant 0 : index
    %c48 = arith.constant 48 : index
    %85 = vector.load %arg7[%c0_38, %c48] : memref<8x64xbf16, #tpu.memory_space<vmem>>, vector<8x4xbf16>
    %cst_39 = arith.constant dense<0.000000e+00> : vector<8x8xf32>
    %86 = tpu.matmul %83, %84, %cst_39 {dimension_numbers = #tpu.dot_dimension_numbers<[1], [1], [0], [0], [0, 0, 1, 0], [], []>} : vector<8x4xbf16>, vector<8x4xbf16>, vector<8x8xf32> -> vector<8x8xf32>
    %cst_40 = arith.constant dense<0xFF800000> : vector<8xf32>
    %87 = vector.multi_reduction <maximumf>, %86, %cst_40 [1] : vector<8x8xf32> to vector<8xf32>
    %88 = vector.shape_cast %87 : vector<8xf32> to vector<8x1xf32>
    %89 = vector.broadcast %88 : vector<8x1xf32> to vector<8x8xf32>
    %90 = arith.subf %86, %89 : vector<8x8xf32>
    %91 = math.exp %90 : vector<8x8xf32>
    %cst_41 = arith.constant dense<0.000000e+00> : vector<8xf32>
    %92 = vector.multi_reduction <add>, %91, %cst_41 [1] : vector<8x8xf32> to vector<8xf32>
    %93 = vector.shape_cast %92 : vector<8xf32> to vector<8x1xf32>
    %94 = arith.truncf %91 : vector<8x8xf32> to vector<8x8xbf16>
    %cst_42 = arith.constant dense<0.000000e+00> : vector<8x4xf32>
    %95 = tpu.matmul %94, %85, %cst_42 {dimension_numbers = #tpu.dot_dimension_numbers<[1], [0], [0], [1], [0, 0, 1, 1], [], []>} : vector<8x8xbf16>, vector<8x4xbf16>, vector<8x4xf32> -> vector<8x4xf32>
    %96 = tpu.reciprocal %93 {approx = true} : vector<8x1xf32> -> vector<8x1xf32>
    %97 = vector.broadcast %96 : vector<8x1xf32> to vector<8x4xf32>
    %98 = arith.mulf %95, %97 : vector<8x4xf32>
    %99 = arith.truncf %98 : vector<8x4xf32> to vector<8x4xbf16>
    %c0_43 = arith.constant 0 : index
    %c16_44 = arith.constant 16 : index
    %100 = vector.load %arg8[%c0_43, %c16_44] : memref<8x32xbf16, #tpu.memory_space<vmem>>, vector<8x4xbf16>
    tpu.vector_store %arg8[%c0_43, %c16_44], %99 {strides = array<i32>} : memref<8x32xbf16, #tpu.memory_space<vmem>>, vector<8x4xbf16>,
    %101 = vector.extract_strided_slice %10 {offsets = [0, 20], sizes = [8, 4], strides = [1, 1]} : vector<8x32xbf16> to vector<8x4xbf16>
    %c0_45 = arith.constant 0 : index
    %c20 = arith.constant 20 : index
    %102 = vector.load %arg7[%c0_45, %c20] : memref<8x64xbf16, #tpu.memory_space<vmem>>, vector<8x4xbf16>
    %c0_46 = arith.constant 0 : index
    %c52 = arith.constant 52 : index
    %103 = vector.load %arg7[%c0_46, %c52] : memref<8x64xbf16, #tpu.memory_space<vmem>>, vector<8x4xbf16>
    %cst_47 = arith.constant dense<0.000000e+00> : vector<8x8xf32>
    %104 = tpu.matmul %101, %102, %cst_47 {dimension_numbers = #tpu.dot_dimension_numbers<[1], [1], [0], [0], [0, 0, 1, 0], [], []>} : vector<8x4xbf16>, vector<8x4xbf16>, vector<8x8xf32> -> vector<8x8xf32>
    %cst_48 = arith.constant dense<0xFF800000> : vector<8xf32>
    %105 = vector.multi_reduction <maximumf>, %104, %cst_48 [1] : vector<8x8xf32> to vector<8xf32>
    %106 = vector.shape_cast %105 : vector<8xf32> to vector<8x1xf32>
    %107 = vector.broadcast %106 : vector<8x1xf32> to vector<8x8xf32>
    %108 = arith.subf %104, %107 : vector<8x8xf32>
    %109 = math.exp %108 : vector<8x8xf32>
    %cst_49 = arith.constant dense<0.000000e+00> : vector<8xf32>
    %110 = vector.multi_reduction <add>, %109, %cst_49 [1] : vector<8x8xf32> to vector<8xf32>
    %111 = vector.shape_cast %110 : vector<8xf32> to vector<8x1xf32>
    %112 = arith.truncf %109 : vector<8x8xf32> to vector<8x8xbf16>
    %cst_50 = arith.constant dense<0.000000e+00> : vector<8x4xf32>
    %113 = tpu.matmul %112, %103, %cst_50 {dimension_numbers = #tpu.dot_dimension_numbers<[1], [0], [0], [1], [0, 0, 1, 1], [], []>} : vector<8x8xbf16>, vector<8x4xbf16>, vector<8x4xf32> -> vector<8x4xf32>
    %114 = tpu.reciprocal %111 {approx = true} : vector<8x1xf32> -> vector<8x1xf32>
    %115 = vector.broadcast %114 : vector<8x1xf32> to vector<8x4xf32>
    %116 = arith.mulf %113, %115 : vector<8x4xf32>
    %117 = arith.truncf %116 : vector<8x4xf32> to vector<8x4xbf16>
    %c0_51 = arith.constant 0 : index
    %c20_52 = arith.constant 20 : index
    %118 = vector.load %arg8[%c0_51, %c20_52] : memref<8x32xbf16, #tpu.memory_space<vmem>>, vector<8x4xbf16>
    tpu.vector_store %arg8[%c0_51, %c20_52], %117 {strides = array<i32>} : memref<8x32xbf16, #tpu.memory_space<vmem>>, vector<8x4xbf16>,
    %119 = vector.extract_strided_slice %10 {offsets = [0, 24], sizes = [8, 4], strides = [1, 1]} : vector<8x32xbf16> to vector<8x4xbf16>
    %c0_53 = arith.constant 0 : index
    %c24 = arith.constant 24 : index
    %120 = vector.load %arg7[%c0_53, %c24] : memref<8x64xbf16, #tpu.memory_space<vmem>>, vector<8x4xbf16>
    %c0_54 = arith.constant 0 : index
    %c56 = arith.constant 56 : index
    %121 = vector.load %arg7[%c0_54, %c56] : memref<8x64xbf16, #tpu.memory_space<vmem>>, vector<8x4xbf16>
    %cst_55 = arith.constant dense<0.000000e+00> : vector<8x8xf32>
    %122 = tpu.matmul %119, %120, %cst_55 {dimension_numbers = #tpu.dot_dimension_numbers<[1], [1], [0], [0], [0, 0, 1, 0], [], []>} : vector<8x4xbf16>, vector<8x4xbf16>, vector<8x8xf32> -> vector<8x8xf32>
    %cst_56 = arith.constant dense<0xFF800000> : vector<8xf32>
    %123 = vector.multi_reduction <maximumf>, %122, %cst_56 [1] : vector<8x8xf32> to vector<8xf32>
    %124 = vector.shape_cast %123 : vector<8xf32> to vector<8x1xf32>
    %125 = vector.broadcast %124 : vector<8x1xf32> to vector<8x8xf32>
    %126 = arith.subf %122, %125 : vector<8x8xf32>
    %127 = math.exp %126 : vector<8x8xf32>
    %cst_57 = arith.constant dense<0.000000e+00> : vector<8xf32>
    %128 = vector.multi_reduction <add>, %127, %cst_57 [1] : vector<8x8xf32> to vector<8xf32>
    %129 = vector.shape_cast %128 : vector<8xf32> to vector<8x1xf32>
    %130 = arith.truncf %127 : vector<8x8xf32> to vector<8x8xbf16>
    %cst_58 = arith.constant dense<0.000000e+00> : vector<8x4xf32>
    %131 = tpu.matmul %130, %121, %cst_58 {dimension_numbers = #tpu.dot_dimension_numbers<[1], [0], [0], [1], [0, 0, 1, 1], [], []>} : vector<8x8xbf16>, vector<8x4xbf16>, vector<8x4xf32> -> vector<8x4xf32>
    %132 = tpu.reciprocal %129 {approx = true} : vector<8x1xf32> -> vector<8x1xf32>
    %133 = vector.broadcast %132 : vector<8x1xf32> to vector<8x4xf32>
    %134 = arith.mulf %131, %133 : vector<8x4xf32>
    %135 = arith.truncf %134 : vector<8x4xf32> to vector<8x4xbf16>
    %c0_59 = arith.constant 0 : index
    %c24_60 = arith.constant 24 : index
    %136 = vector.load %arg8[%c0_59, %c24_60] : memref<8x32xbf16, #tpu.memory_space<vmem>>, vector<8x4xbf16>
    tpu.vector_store %arg8[%c0_59, %c24_60], %135 {strides = array<i32>} : memref<8x32xbf16, #tpu.memory_space<vmem>>, vector<8x4xbf16>,
    %137 = vector.extract_strided_slice %10 {offsets = [0, 28], sizes = [8, 4], strides = [1, 1]} : vector<8x32xbf16> to vector<8x4xbf16>
    %c0_61 = arith.constant 0 : index
    %c28 = arith.constant 28 : index
    %138 = vector.load %arg7[%c0_61, %c28] : memref<8x64xbf16, #tpu.memory_space<vmem>>, vector<8x4xbf16>
    %c0_62 = arith.constant 0 : index
    %c60 = arith.constant 60 : index
    %139 = vector.load %arg7[%c0_62, %c60] : memref<8x64xbf16, #tpu.memory_space<vmem>>, vector<8x4xbf16>
    %cst_63 = arith.constant dense<0.000000e+00> : vector<8x8xf32>
    %140 = tpu.matmul %137, %138, %cst_63 {dimension_numbers = #tpu.dot_dimension_numbers<[1], [1], [0], [0], [0, 0, 1, 0], [], []>} : vector<8x4xbf16>, vector<8x4xbf16>, vector<8x8xf32> -> vector<8x8xf32>
    %cst_64 = arith.constant dense<0xFF800000> : vector<8xf32>
    %141 = vector.multi_reduction <maximumf>, %140, %cst_64 [1] : vector<8x8xf32> to vector<8xf32>
    %142 = vector.shape_cast %141 : vector<8xf32> to vector<8x1xf32>
    %143 = vector.broadcast %142 : vector<8x1xf32> to vector<8x8xf32>
    %144 = arith.subf %140, %143 : vector<8x8xf32>
    %145 = math.exp %144 : vector<8x8xf32>
    %cst_65 = arith.constant dense<0.000000e+00> : vector<8xf32>
    %146 = vector.multi_reduction <add>, %145, %cst_65 [1] : vector<8x8xf32> to vector<8xf32>
    %147 = vector.shape_cast %146 : vector<8xf32> to vector<8x1xf32>
    %148 = arith.truncf %145 : vector<8x8xf32> to vector<8x8xbf16>
    %cst_66 = arith.constant dense<0.000000e+00> : vector<8x4xf32>
    %149 = tpu.matmul %148, %139, %cst_66 {dimension_numbers = #tpu.dot_dimension_numbers<[1], [0], [0], [1], [0, 0, 1, 1], [], []>} : vector<8x8xbf16>, vector<8x4xbf16>, vector<8x4xf32> -> vector<8x4xf32>
    %150 = tpu.reciprocal %147 {approx = true} : vector<8x1xf32> -> vector<8x1xf32>
    %151 = vector.broadcast %150 : vector<8x1xf32> to vector<8x4xf32>
    %152 = arith.mulf %149, %151 : vector<8x4xf32>
    %153 = arith.truncf %152 : vector<8x4xf32> to vector<8x4xbf16>
    %c0_67 = arith.constant 0 : index
    %c28_68 = arith.constant 28 : index
    %154 = vector.load %arg8[%c0_67, %c28_68] : memref<8x32xbf16, #tpu.memory_space<vmem>>, vector<8x4xbf16>
    tpu.vector_store %arg8[%c0_67, %c28_68], %153 {strides = array<i32>} : memref<8x32xbf16, #tpu.memory_space<vmem>>, vector<8x4xbf16>,
    %c0_69 = arith.constant 0 : index
    %c0_70 = arith.constant 0 : index
    %155 = vector.load %arg8[%c0_69, %c0_70] : memref<8x32xbf16, #tpu.memory_space<vmem>>, vector<8x32xbf16>
    %c0_71 = arith.constant 0 : index
    %c0_72 = arith.constant 0 : index
    %156 = vector.load %arg5[%c0_71, %c0_72] : memref<32x32xbf16, #tpu.memory_space<vmem>>, vector<32x32xbf16>
    %cst_73 = arith.constant dense<0.000000e+00> : vector<8x32xf32>
    %157 = tpu.matmul %155, %156, %cst_73 {dimension_numbers = #tpu.dot_dimension_numbers<[1], [0], [0], [1], [0, 0, 1, 1], [], []>} : vector<8x32xbf16>, vector<32x32xbf16>, vector<8x32xf32> -> vector<8x32xf32>
    %c0_74 = arith.constant 0 : index
    %c0_75 = arith.constant 0 : index
    %c0_76 = arith.constant 0 : index
    %158 = vector.load %arg6[%c0_74, %c0_75, %c0_76] : memref<1x8x32xf32, #tpu.memory_space<vmem>>, vector<1x8x32xf32>
    %159 = vector.shape_cast %158 : vector<1x8x32xf32> to vector<8x32xf32>
    %160 = vector.shape_cast %157 : vector<8x32xf32> to vector<1x8x32xf32>
    tpu.vector_store %arg6[%c0_74, %c0_75, %c0_76], %160 {strides = array<i32>} : memref<1x8x32xf32, #tpu.memory_space<vmem>>, vector<1x8x32xf32>,
    return
  }
  func.func @transform_0(%arg0: i32, %arg1: i32) -> (i32, i32, i32) {
    %c0_i32 = arith.constant 0 : i32
    %c0_i32_0 = arith.constant 0 : i32
    %c0_i32_1 = arith.constant 0 : i32
    return %arg0, %c0_i32, %c0_i32_0 : i32, i32, i32
  }
  func.func @transform_1(%arg0: i32, %arg1: i32) -> (i32, i32) {
    %c0_i32 = arith.constant 0 : i32
    %c0_i32_0 = arith.constant 0 : i32
    %c0_i32_1 = arith.constant 0 : i32
    return %c0_i32, %c0_i32_0 : i32, i32
  }
  func.func @transform_2(%arg0: i32, %arg1: i32) -> (i32, i32) {
    %c0_i32 = arith.constant 0 : i32
    %c0_i32_0 = arith.constant 0 : i32
    %c0_i32_1 = arith.constant 0 : i32
    return %c0_i32, %c0_i32_0 : i32, i32
  }
  func.func @transform_3(%arg0: i32, %arg1: i32) -> (i32, i32) {
    %c0_i32 = arith.constant 0 : i32
    %c0_i32_0 = arith.constant 0 : i32
    %c0_i32_1 = arith.constant 0 : i32
    return %c0_i32, %c0_i32_0 : i32, i32
  }
  func.func @transform_4(%arg0: i32, %arg1: i32) -> (i32, i32, i32) {
    %c0_i32 = arith.constant 0 : i32
    %c0_i32_0 = arith.constant 0 : i32
    return %arg0, %arg1, %c0_i32 : i32, i32, i32
  }
}

module attributes {stable_mosaic.version = 11 : i64} {
  func.func @_mhsa_fused_kernel(%arg0: i32, %arg1: i32, %arg2: memref<1x8x32xbf16, #tpu.memory_space<vmem>>, %arg3: memref<32x32xbf16, #tpu.memory_space<vmem>>, %arg4: memref<32x64xbf16, #tpu.memory_space<vmem>>, %arg5: memref<32x32xbf16, #tpu.memory_space<vmem>>, %arg6: memref<1x8x32xf32, #tpu.memory_space<vmem>>, %arg7: memref<8x64xbf16, #tpu.memory_space<vmem>>, %arg8: memref<8x32xbf16, #tpu.memory_space<vmem>>) attributes {dimension_semantics = [#tpu.dimension_semantics<parallel>, #tpu.dimension_semantics<arbitrary>], iteration_bounds = array<i64: 2, 1>, scalar_prefetch = 0 : i64, scratch_operands = 2 : i64, tpu.core_type = #tpu.core_type<tc>, window_params = [{transform_indices = @transform_0, window_bounds = array<i64: 1, 8, 32>}, {pipeline_mode = #tpu.pipeline_mode<synchronous>, transform_indices = @transform_1, window_bounds = array<i64: 32, 32>}, {pipeline_mode = #tpu.pipeline_mode<synchronous>, transform_indices = @transform_2, window_bounds = array<i64: 32, 64>}, {pipeline_mode = #tpu.pipeline_mode<synchronous>, transform_indices = @transform_3, window_bounds = array<i64: 32, 32>}, {transform_indices = @transform_4, window_bounds = array<i64: 1, 8, 32>}]} {
    %c0_i32 = arith.constant 0 : i32
    %0 = arith.cmpi eq, %arg1, %c0_i32 : i32
    %1 = arith.extui %0 : i1 to i32
    %c0_i32_0 = arith.constant 0 : i32
    %2 = arith.cmpi ne, %1, %c0_i32_0 : i32
    scf.if %2 {
      %c0_77 = arith.constant 0 : index
      %c0_78 = arith.constant 0 : index
      %c0_79 = arith.constant 0 : index
      %161 = vector.load %arg2[%c0_77, %c0_78, %c0_79] : memref<1x8x32xbf16, #tpu.memory_space<vmem>>, vector<1x8x32xbf16>
      %162 = vector.shape_cast %161 : vector<1x8x32xbf16> to vector<8x32xbf16>
      %c0_80 = arith.constant 0 : index
      %c0_81 = arith.constant 0 : index
      %163 = vector.load %arg4[%c0_80, %c0_81] : memref<32x64xbf16, #tpu.memory_space<vmem>>, vector<32x64xbf16>
      %cst_82 = arith.constant dense<0.000000e+00> : vector<8x64xf32>
      %164 = tpu.matmul %162, %163, %cst_82 {dimension_numbers = #tpu.dot_dimension_numbers<[1], [0], [0], [1], [0, 0, 1, 1], [], []>} : vector<8x32xbf16>, vector<32x64xbf16>, vector<8x64xf32> -> vector<8x64xf32>
      %165 = arith.truncf %164 : vector<8x64xf32> to vector<8x64xbf16>
      %c0_83 = arith.constant 0 : index
      %c0_84 = arith.constant 0 : index
      %166 = vector.load %arg7[%c0_83, %c0_84] : memref<8x64xbf16, #tpu.memory_space<vmem>>, vector<8x64xbf16>
      tpu.vector_store %arg7[%c0_83, %c0_84], %165 {strides = array<i32>} : memref<8x64xbf16, #tpu.memory_space<vmem>>, vector<8x64xbf16>,
    } else {
    }
    %c8_i32 = arith.constant 8 : i32
    %3 = arith.muli %arg1, %c8_i32 : i32
    %4 = tpu.assume_multiple %3, 8 : i32
    %c0 = arith.constant 0 : index
    %5 = arith.index_cast %4 : i32 to index
    %c0_1 = arith.constant 0 : index
    %6 = vector.load %arg2[%c0, %5, %c0_1] : memref<1x8x32xbf16, #tpu.memory_space<vmem>>, vector<1x8x32xbf16>
    %7 = vector.shape_cast %6 : vector<1x8x32xbf16> to vector<8x32xbf16>
    %c0_2 = arith.constant 0 : index
    %c0_3 = arith.constant 0 : index
    %8 = vector.load %arg3[%c0_2, %c0_3] : memref<32x32xbf16, #tpu.memory_space<vmem>>, vector<32x32xbf16>
    %cst = arith.constant dense<0.000000e+00> : vector<8x32xf32>
    %9 = tpu.matmul %7, %8, %cst {dimension_numbers = #tpu.dot_dimension_numbers<[1], [0], [0], [1], [0, 0, 1, 1], [], []>} : vector<8x32xbf16>, vector<32x32xbf16>, vector<8x32xf32> -> vector<8x32xf32>
    %10 = arith.truncf %9 : vector<8x32xf32> to vector<8x32xbf16>
    %11 = vector.extract_strided_slice %10 {offsets = [0, 0], sizes = [8, 4], strides = [1, 1]} : vector<8x32xbf16> to vector<8x4xbf16>
    %c0_4 = arith.constant 0 : index
    %c0_5 = arith.constant 0 : index
    %12 = vector.load %arg7[%c0_4, %c0_5] : memref<8x64xbf16, #tpu.memory_space<vmem>>, vector<8x4xbf16>
    %c0_6 = arith.constant 0 : index
    %c32 = arith.constant 32 : index
    %13 = vector.load %arg7[%c0_6, %c32] : memref<8x64xbf16, #tpu.memory_space<vmem>>, vector<8x4xbf16>
    %cst_7 = arith.constant dense<0.000000e+00> : vector<8x8xf32>
    %14 = tpu.matmul %11, %12, %cst_7 {dimension_numbers = #tpu.dot_dimension_numbers<[1], [1], [0], [0], [0, 0, 1, 0], [], []>} : vector<8x4xbf16>, vector<8x4xbf16>, vector<8x8xf32> -> vector<8x8xf32>
    %cst_8 = arith.constant dense<0xFF800000> : vector<8xf32>
    %15 = vector.multi_reduction <maximumf>, %14, %cst_8 [1] : vector<8x8xf32> to vector<8xf32>
    %16 = vector.shape_cast %15 : vector<8xf32> to vector<8x1xf32>
    %17 = vector.broadcast %16 : vector<8x1xf32> to vector<8x8xf32>
    %18 = arith.subf %14, %17 : vector<8x8xf32>
    %19 = math.exp %18 : vector<8x8xf32>
    %cst_9 = arith.constant dense<0.000000e+00> : vector<8xf32>
    %20 = vector.multi_reduction <add>, %19, %cst_9 [1] : vector<8x8xf32> to vector<8xf32>
    %21 = vector.shape_cast %20 : vector<8xf32> to vector<8x1xf32>
    %22 = arith.truncf %19 : vector<8x8xf32> to vector<8x8xbf16>
    %cst_10 = arith.constant dense<0.000000e+00> : vector<8x4xf32>
    %23 = tpu.matmul %22, %13, %cst_10 {dimension_numbers = #tpu.dot_dimension_numbers<[1], [0], [0], [1], [0, 0, 1, 1], [], []>} : vector<8x8xbf16>, vector<8x4xbf16>, vector<8x4xf32> -> vector<8x4xf32>
    %24 = tpu.reciprocal %21 {approx = true} : vector<8x1xf32> -> vector<8x1xf32>
    %25 = vector.broadcast %24 : vector<8x1xf32> to vector<8x4xf32>
    %26 = arith.mulf %23, %25 : vector<8x4xf32>
    %27 = arith.truncf %26 : vector<8x4xf32> to vector<8x4xbf16>
    %c0_11 = arith.constant 0 : index
    %c0_12 = arith.constant 0 : index
    %28 = vector.load %arg8[%c0_11, %c0_12] : memref<8x32xbf16, #tpu.memory_space<vmem>>, vector<8x4xbf16>
    tpu.vector_store %arg8[%c0_11, %c0_12], %27 {strides = array<i32>} : memref<8x32xbf16, #tpu.memory_space<vmem>>, vector<8x4xbf16>,
    %29 = vector.extract_strided_slice %10 {offsets = [0, 4], sizes = [8, 4], strides = [1, 1]} : vector<8x32xbf16> to vector<8x4xbf16>
    %c0_13 = arith.constant 0 : index
    %c4 = arith.constant 4 : index
    %30 = vector.load %arg7[%c0_13, %c4] : memref<8x64xbf16, #tpu.memory_space<vmem>>, vector<8x4xbf16>
    %c0_14 = arith.constant 0 : index
    %c36 = arith.constant 36 : index
    %31 = vector.load %arg7[%c0_14, %c36] : memref<8x64xbf16, #tpu.memory_space<vmem>>, vector<8x4xbf16>
    %cst_15 = arith.constant dense<0.000000e+00> : vector<8x8xf32>
    %32 = tpu.matmul %29, %30, %cst_15 {dimension_numbers = #tpu.dot_dimension_numbers<[1], [1], [0], [0], [0, 0, 1, 0], [], []>} : vector<8x4xbf16>, vector<8x4xbf16>, vector<8x8xf32> -> vector<8x8xf32>
    %cst_16 = arith.constant dense<0xFF800000> : vector<8xf32>
    %33 = vector.multi_reduction <maximumf>, %32, %cst_16 [1] : vector<8x8xf32> to vector<8xf32>
    %34 = vector.shape_cast %33 : vector<8xf32> to vector<8x1xf32>
    %35 = vector.broadcast %34 : vector<8x1xf32> to vector<8x8xf32>
    %36 = arith.subf %32, %35 : vector<8x8xf32>
    %37 = math.exp %36 : vector<8x8xf32>
    %cst_17 = arith.constant dense<0.000000e+00> : vector<8xf32>
    %38 = vector.multi_reduction <add>, %37, %cst_17 [1] : vector<8x8xf32> to vector<8xf32>
    %39 = vector.shape_cast %38 : vector<8xf32> to vector<8x1xf32>
    %40 = arith.truncf %37 : vector<8x8xf32> to vector<8x8xbf16>
    %cst_18 = arith.constant dense<0.000000e+00> : vector<8x4xf32>
    %41 = tpu.matmul %40, %31, %cst_18 {dimension_numbers = #tpu.dot_dimension_numbers<[1], [0], [0], [1], [0, 0, 1, 1], [], []>} : vector<8x8xbf16>, vector<8x4xbf16>, vector<8x4xf32> -> vector<8x4xf32>
    %42 = tpu.reciprocal %39 {approx = true} : vector<8x1xf32> -> vector<8x1xf32>
    %43 = vector.broadcast %42 : vector<8x1xf32> to vector<8x4xf32>
    %44 = arith.mulf %41, %43 : vector<8x4xf32>
    %45 = arith.truncf %44 : vector<8x4xf32> to vector<8x4xbf16>
    %c0_19 = arith.constant 0 : index
    %c4_20 = arith.constant 4 : index
    %46 = vector.load %arg8[%c0_19, %c4_20] : memref<8x32xbf16, #tpu.memory_space<vmem>>, vector<8x4xbf16>
    tpu.vector_store %arg8[%c0_19, %c4_20], %45 {strides = array<i32>} : memref<8x32xbf16, #tpu.memory_space<vmem>>, vector<8x4xbf16>,
    %47 = vector.extract_strided_slice %10 {offsets = [0, 8], sizes = [8, 4], strides = [1, 1]} : vector<8x32xbf16> to vector<8x4xbf16>
    %c0_21 = arith.constant 0 : index
    %c8 = arith.constant 8 : index
    %48 = vector.load %arg7[%c0_21, %c8] : memref<8x64xbf16, #tpu.memory_space<vmem>>, vector<8x4xbf16>
    %c0_22 = arith.constant 0 : index
    %c40 = arith.constant 40 : index
    %49 = vector.load %arg7[%c0_22, %c40] : memref<8x64xbf16, #tpu.memory_space<vmem>>, vector<8x4xbf16>
    %cst_23 = arith.constant dense<0.000000e+00> : vector<8x8xf32>
    %50 = tpu.matmul %47, %48, %cst_23 {dimension_numbers = #tpu.dot_dimension_numbers<[1], [1], [0], [0], [0, 0, 1, 0], [], []>} : vector<8x4xbf16>, vector<8x4xbf16>, vector<8x8xf32> -> vector<8x8xf32>
    %cst_24 = arith.constant dense<0xFF800000> : vector<8xf32>
    %51 = vector.multi_reduction <maximumf>, %50, %cst_24 [1] : vector<8x8xf32> to vector<8xf32>
    %52 = vector.shape_cast %51 : vector<8xf32> to vector<8x1xf32>
    %53 = vector.broadcast %52 : vector<8x1xf32> to vector<8x8xf32>
    %54 = arith.subf %50, %53 : vector<8x8xf32>
    %55 = math.exp %54 : vector<8x8xf32>
    %cst_25 = arith.constant dense<0.000000e+00> : vector<8xf32>
    %56 = vector.multi_reduction <add>, %55, %cst_25 [1] : vector<8x8xf32> to vector<8xf32>
    %57 = vector.shape_cast %56 : vector<8xf32> to vector<8x1xf32>
    %58 = arith.truncf %55 : vector<8x8xf32> to vector<8x8xbf16>
    %cst_26 = arith.constant dense<0.000000e+00> : vector<8x4xf32>
    %59 = tpu.matmul %58, %49, %cst_26 {dimension_numbers = #tpu.dot_dimension_numbers<[1], [0], [0], [1], [0, 0, 1, 1], [], []>} : vector<8x8xbf16>, vector<8x4xbf16>, vector<8x4xf32> -> vector<8x4xf32>
    %60 = tpu.reciprocal %57 {approx = true} : vector<8x1xf32> -> vector<8x1xf32>
    %61 = vector.broadcast %60 : vector<8x1xf32> to vector<8x4xf32>
    %62 = arith.mulf %59, %61 : vector<8x4xf32>
    %63 = arith.truncf %62 : vector<8x4xf32> to vector<8x4xbf16>
    %c0_27 = arith.constant 0 : index
    %c8_28 = arith.constant 8 : index
    %64 = vector.load %arg8[%c0_27, %c8_28] : memref<8x32xbf16, #tpu.memory_space<vmem>>, vector<8x4xbf16>
    tpu.vector_store %arg8[%c0_27, %c8_28], %63 {strides = array<i32>} : memref<8x32xbf16, #tpu.memory_space<vmem>>, vector<8x4xbf16>,
    %65 = vector.extract_strided_slice %10 {offsets = [0, 12], sizes = [8, 4], strides = [1, 1]} : vector<8x32xbf16> to vector<8x4xbf16>
    %c0_29 = arith.constant 0 : index
    %c12 = arith.constant 12 : index
    %66 = vector.load %arg7[%c0_29, %c12] : memref<8x64xbf16, #tpu.memory_space<vmem>>, vector<8x4xbf16>
    %c0_30 = arith.constant 0 : index
    %c44 = arith.constant 44 : index
    %67 = vector.load %arg7[%c0_30, %c44] : memref<8x64xbf16, #tpu.memory_space<vmem>>, vector<8x4xbf16>
    %cst_31 = arith.constant dense<0.000000e+00> : vector<8x8xf32>
    %68 = tpu.matmul %65, %66, %cst_31 {dimension_numbers = #tpu.dot_dimension_numbers<[1], [1], [0], [0], [0, 0, 1, 0], [], []>} : vector<8x4xbf16>, vector<8x4xbf16>, vector<8x8xf32> -> vector<8x8xf32>
    %cst_32 = arith.constant dense<0xFF800000> : vector<8xf32>
    %69 = vector.multi_reduction <maximumf>, %68, %cst_32 [1] : vector<8x8xf32> to vector<8xf32>
    %70 = vector.shape_cast %69 : vector<8xf32> to vector<8x1xf32>
    %71 = vector.broadcast %70 : vector<8x1xf32> to vector<8x8xf32>
    %72 = arith.subf %68, %71 : vector<8x8xf32>
    %73 = math.exp %72 : vector<8x8xf32>
    %cst_33 = arith.constant dense<0.000000e+00> : vector<8xf32>
    %74 = vector.multi_reduction <add>, %73, %cst_33 [1] : vector<8x8xf32> to vector<8xf32>
    %75 = vector.shape_cast %74 : vector<8xf32> to vector<8x1xf32>
    %76 = arith.truncf %73 : vector<8x8xf32> to vector<8x8xbf16>
    %cst_34 = arith.constant dense<0.000000e+00> : vector<8x4xf32>
    %77 = tpu.matmul %76, %67, %cst_34 {dimension_numbers = #tpu.dot_dimension_numbers<[1], [0], [0], [1], [0, 0, 1, 1], [], []>} : vector<8x8xbf16>, vector<8x4xbf16>, vector<8x4xf32> -> vector<8x4xf32>
    %78 = tpu.reciprocal %75 {approx = true} : vector<8x1xf32> -> vector<8x1xf32>
    %79 = vector.broadcast %78 : vector<8x1xf32> to vector<8x4xf32>
    %80 = arith.mulf %77, %79 : vector<8x4xf32>
    %81 = arith.truncf %80 : vector<8x4xf32> to vector<8x4xbf16>
    %c0_35 = arith.constant 0 : index
    %c12_36 = arith.constant 12 : index
    %82 = vector.load %arg8[%c0_35, %c12_36] : memref<8x32xbf16, #tpu.memory_space<vmem>>, vector<8x4xbf16>
    tpu.vector_store %arg8[%c0_35, %c12_36], %81 {strides = array<i32>} : memref<8x32xbf16, #tpu.memory_space<vmem>>, vector<8x4xbf16>,
    %83 = vector.extract_strided_slice %10 {offsets = [0, 16], sizes = [8, 4], strides = [1, 1]} : vector<8x32xbf16> to vector<8x4xbf16>
    %c0_37 = arith.constant 0 : index
    %c16 = arith.constant 16 : index
    %84 = vector.load %arg7[%c0_37, %c16] : memref<8x64xbf16, #tpu.memory_space<vmem>>, vector<8x4xbf16>
    %c0_38 = arith.constant 0 : index
    %c48 = arith.constant 48 : index
    %85 = vector.load %arg7[%c0_38, %c48] : memref<8x64xbf16, #tpu.memory_space<vmem>>, vector<8x4xbf16>
    %cst_39 = arith.constant dense<0.000000e+00> : vector<8x8xf32>
    %86 = tpu.matmul %83, %84, %cst_39 {dimension_numbers = #tpu.dot_dimension_numbers<[1], [1], [0], [0], [0, 0, 1, 0], [], []>} : vector<8x4xbf16>, vector<8x4xbf16>, vector<8x8xf32> -> vector<8x8xf32>
    %cst_40 = arith.constant dense<0xFF800000> : vector<8xf32>
    %87 = vector.multi_reduction <maximumf>, %86, %cst_40 [1] : vector<8x8xf32> to vector<8xf32>
    %88 = vector.shape_cast %87 : vector<8xf32> to vector<8x1xf32>
    %89 = vector.broadcast %88 : vector<8x1xf32> to vector<8x8xf32>
    %90 = arith.subf %86, %89 : vector<8x8xf32>
    %91 = math.exp %90 : vector<8x8xf32>
    %cst_41 = arith.constant dense<0.000000e+00> : vector<8xf32>
    %92 = vector.multi_reduction <add>, %91, %cst_41 [1] : vector<8x8xf32> to vector<8xf32>
    %93 = vector.shape_cast %92 : vector<8xf32> to vector<8x1xf32>
    %94 = arith.truncf %91 : vector<8x8xf32> to vector<8x8xbf16>
    %cst_42 = arith.constant dense<0.000000e+00> : vector<8x4xf32>
    %95 = tpu.matmul %94, %85, %cst_42 {dimension_numbers = #tpu.dot_dimension_numbers<[1], [0], [0], [1], [0, 0, 1, 1], [], []>} : vector<8x8xbf16>, vector<8x4xbf16>, vector<8x4xf32> -> vector<8x4xf32>
    %96 = tpu.reciprocal %93 {approx = true} : vector<8x1xf32> -> vector<8x1xf32>
    %97 = vector.broadcast %96 : vector<8x1xf32> to vector<8x4xf32>
    %98 = arith.mulf %95, %97 : vector<8x4xf32>
    %99 = arith.truncf %98 : vector<8x4xf32> to vector<8x4xbf16>
    %c0_43 = arith.constant 0 : index
    %c16_44 = arith.constant 16 : index
    %100 = vector.load %arg8[%c0_43, %c16_44] : memref<8x32xbf16, #tpu.memory_space<vmem>>, vector<8x4xbf16>
    tpu.vector_store %arg8[%c0_43, %c16_44], %99 {strides = array<i32>} : memref<8x32xbf16, #tpu.memory_space<vmem>>, vector<8x4xbf16>,
    %101 = vector.extract_strided_slice %10 {offsets = [0, 20], sizes = [8, 4], strides = [1, 1]} : vector<8x32xbf16> to vector<8x4xbf16>
    %c0_45 = arith.constant 0 : index
    %c20 = arith.constant 20 : index
    %102 = vector.load %arg7[%c0_45, %c20] : memref<8x64xbf16, #tpu.memory_space<vmem>>, vector<8x4xbf16>
    %c0_46 = arith.constant 0 : index
    %c52 = arith.constant 52 : index
    %103 = vector.load %arg7[%c0_46, %c52] : memref<8x64xbf16, #tpu.memory_space<vmem>>, vector<8x4xbf16>
    %cst_47 = arith.constant dense<0.000000e+00> : vector<8x8xf32>
    %104 = tpu.matmul %101, %102, %cst_47 {dimension_numbers = #tpu.dot_dimension_numbers<[1], [1], [0], [0], [0, 0, 1, 0], [], []>} : vector<8x4xbf16>, vector<8x4xbf16>, vector<8x8xf32> -> vector<8x8xf32>
    %cst_48 = arith.constant dense<0xFF800000> : vector<8xf32>
    %105 = vector.multi_reduction <maximumf>, %104, %cst_48 [1] : vector<8x8xf32> to vector<8xf32>
    %106 = vector.shape_cast %105 : vector<8xf32> to vector<8x1xf32>
    %107 = vector.broadcast %106 : vector<8x1xf32> to vector<8x8xf32>
    %108 = arith.subf %104, %107 : vector<8x8xf32>
    %109 = math.exp %108 : vector<8x8xf32>
    %cst_49 = arith.constant dense<0.000000e+00> : vector<8xf32>
    %110 = vector.multi_reduction <add>, %109, %cst_49 [1] : vector<8x8xf32> to vector<8xf32>
    %111 = vector.shape_cast %110 : vector<8xf32> to vector<8x1xf32>
    %112 = arith.truncf %109 : vector<8x8xf32> to vector<8x8xbf16>
    %cst_50 = arith.constant dense<0.000000e+00> : vector<8x4xf32>
    %113 = tpu.matmul %112, %103, %cst_50 {dimension_numbers = #tpu.dot_dimension_numbers<[1], [0], [0], [1], [0, 0, 1, 1], [], []>} : vector<8x8xbf16>, vector<8x4xbf16>, vector<8x4xf32> -> vector<8x4xf32>
    %114 = tpu.reciprocal %111 {approx = true} : vector<8x1xf32> -> vector<8x1xf32>
    %115 = vector.broadcast %114 : vector<8x1xf32> to vector<8x4xf32>
    %116 = arith.mulf %113, %115 : vector<8x4xf32>
    %117 = arith.truncf %116 : vector<8x4xf32> to vector<8x4xbf16>
    %c0_51 = arith.constant 0 : index
    %c20_52 = arith.constant 20 : index
    %118 = vector.load %arg8[%c0_51, %c20_52] : memref<8x32xbf16, #tpu.memory_space<vmem>>, vector<8x4xbf16>
    tpu.vector_store %arg8[%c0_51, %c20_52], %117 {strides = array<i32>} : memref<8x32xbf16, #tpu.memory_space<vmem>>, vector<8x4xbf16>,
    %119 = vector.extract_strided_slice %10 {offsets = [0, 24], sizes = [8, 4], strides = [1, 1]} : vector<8x32xbf16> to vector<8x4xbf16>
    %c0_53 = arith.constant 0 : index
    %c24 = arith.constant 24 : index
    %120 = vector.load %arg7[%c0_53, %c24] : memref<8x64xbf16, #tpu.memory_space<vmem>>, vector<8x4xbf16>
    %c0_54 = arith.constant 0 : index
    %c56 = arith.constant 56 : index
    %121 = vector.load %arg7[%c0_54, %c56] : memref<8x64xbf16, #tpu.memory_space<vmem>>, vector<8x4xbf16>
    %cst_55 = arith.constant dense<0.000000e+00> : vector<8x8xf32>
    %122 = tpu.matmul %119, %120, %cst_55 {dimension_numbers = #tpu.dot_dimension_numbers<[1], [1], [0], [0], [0, 0, 1, 0], [], []>} : vector<8x4xbf16>, vector<8x4xbf16>, vector<8x8xf32> -> vector<8x8xf32>
    %cst_56 = arith.constant dense<0xFF800000> : vector<8xf32>
    %123 = vector.multi_reduction <maximumf>, %122, %cst_56 [1] : vector<8x8xf32> to vector<8xf32>
    %124 = vector.shape_cast %123 : vector<8xf32> to vector<8x1xf32>
    %125 = vector.broadcast %124 : vector<8x1xf32> to vector<8x8xf32>
    %126 = arith.subf %122, %125 : vector<8x8xf32>
    %127 = math.exp %126 : vector<8x8xf32>
    %cst_57 = arith.constant dense<0.000000e+00> : vector<8xf32>
    %128 = vector.multi_reduction <add>, %127, %cst_57 [1] : vector<8x8xf32> to vector<8xf32>
    %129 = vector.shape_cast %128 : vector<8xf32> to vector<8x1xf32>
    %130 = arith.truncf %127 : vector<8x8xf32> to vector<8x8xbf16>
    %cst_58 = arith.constant dense<0.000000e+00> : vector<8x4xf32>
    %131 = tpu.matmul %130, %121, %cst_58 {dimension_numbers = #tpu.dot_dimension_numbers<[1], [0], [0], [1], [0, 0, 1, 1], [], []>} : vector<8x8xbf16>, vector<8x4xbf16>, vector<8x4xf32> -> vector<8x4xf32>
    %132 = tpu.reciprocal %129 {approx = true} : vector<8x1xf32> -> vector<8x1xf32>
    %133 = vector.broadcast %132 : vector<8x1xf32> to vector<8x4xf32>
    %134 = arith.mulf %131, %133 : vector<8x4xf32>
    %135 = arith.truncf %134 : vector<8x4xf32> to vector<8x4xbf16>
    %c0_59 = arith.constant 0 : index
    %c24_60 = arith.constant 24 : index
    %136 = vector.load %arg8[%c0_59, %c24_60] : memref<8x32xbf16, #tpu.memory_space<vmem>>, vector<8x4xbf16>
    tpu.vector_store %arg8[%c0_59, %c24_60], %135 {strides = array<i32>} : memref<8x32xbf16, #tpu.memory_space<vmem>>, vector<8x4xbf16>,
    %137 = vector.extract_strided_slice %10 {offsets = [0, 28], sizes = [8, 4], strides = [1, 1]} : vector<8x32xbf16> to vector<8x4xbf16>
    %c0_61 = arith.constant 0 : index
    %c28 = arith.constant 28 : index
    %138 = vector.load %arg7[%c0_61, %c28] : memref<8x64xbf16, #tpu.memory_space<vmem>>, vector<8x4xbf16>
    %c0_62 = arith.constant 0 : index
    %c60 = arith.constant 60 : index
    %139 = vector.load %arg7[%c0_62, %c60] : memref<8x64xbf16, #tpu.memory_space<vmem>>, vector<8x4xbf16>
    %cst_63 = arith.constant dense<0.000000e+00> : vector<8x8xf32>
    %140 = tpu.matmul %137, %138, %cst_63 {dimension_numbers = #tpu.dot_dimension_numbers<[1], [1], [0], [0], [0, 0, 1, 0], [], []>} : vector<8x4xbf16>, vector<8x4xbf16>, vector<8x8xf32> -> vector<8x8xf32>
    %cst_64 = arith.constant dense<0xFF800000> : vector<8xf32>
    %141 = vector.multi_reduction <maximumf>, %140, %cst_64 [1] : vector<8x8xf32> to vector<8xf32>
    %142 = vector.shape_cast %141 : vector<8xf32> to vector<8x1xf32>
    %143 = vector.broadcast %142 : vector<8x1xf32> to vector<8x8xf32>
    %144 = arith.subf %140, %143 : vector<8x8xf32>
    %145 = math.exp %144 : vector<8x8xf32>
    %cst_65 = arith.constant dense<0.000000e+00> : vector<8xf32>
    %146 = vector.multi_reduction <add>, %145, %cst_65 [1] : vector<8x8xf32> to vector<8xf32>
    %147 = vector.shape_cast %146 : vector<8xf32> to vector<8x1xf32>
    %148 = arith.truncf %145 : vector<8x8xf32> to vector<8x8xbf16>
    %cst_66 = arith.constant dense<0.000000e+00> : vector<8x4xf32>
    %149 = tpu.matmul %148, %139, %cst_66 {dimension_numbers = #tpu.dot_dimension_numbers<[1], [0], [0], [1], [0, 0, 1, 1], [], []>} : vector<8x8xbf16>, vector<8x4xbf16>, vector<8x4xf32> -> vector<8x4xf32>
    %150 = tpu.reciprocal %147 {approx = true} : vector<8x1xf32> -> vector<8x1xf32>
    %151 = vector.broadcast %150 : vector<8x1xf32> to vector<8x4xf32>
    %152 = arith.mulf %149, %151 : vector<8x4xf32>
    %153 = arith.truncf %152 : vector<8x4xf32> to vector<8x4xbf16>
    %c0_67 = arith.constant 0 : index
    %c28_68 = arith.constant 28 : index
    %154 = vector.load %arg8[%c0_67, %c28_68] : memref<8x32xbf16, #tpu.memory_space<vmem>>, vector<8x4xbf16>
    tpu.vector_store %arg8[%c0_67, %c28_68], %153 {strides = array<i32>} : memref<8x32xbf16, #tpu.memory_space<vmem>>, vector<8x4xbf16>,
    %c0_69 = arith.constant 0 : index
    %c0_70 = arith.constant 0 : index
    %155 = vector.load %arg8[%c0_69, %c0_70] : memref<8x32xbf16, #tpu.memory_space<vmem>>, vector<8x32xbf16>
    %c0_71 = arith.constant 0 : index
    %c0_72 = arith.constant 0 : index
    %156 = vector.load %arg5[%c0_71, %c0_72] : memref<32x32xbf16, #tpu.memory_space<vmem>>, vector<32x32xbf16>
    %cst_73 = arith.constant dense<0.000000e+00> : vector<8x32xf32>
    %157 = tpu.matmul %155, %156, %cst_73 {dimension_numbers = #tpu.dot_dimension_numbers<[1], [0], [0], [1], [0, 0, 1, 1], [], []>} : vector<8x32xbf16>, vector<32x32xbf16>, vector<8x32xf32> -> vector<8x32xf32>
    %c0_74 = arith.constant 0 : index
    %c0_75 = arith.constant 0 : index
    %c0_76 = arith.constant 0 : index
    %158 = vector.load %arg6[%c0_74, %c0_75, %c0_76] : memref<1x8x32xf32, #tpu.memory_space<vmem>>, vector<1x8x32xf32>
    %159 = vector.shape_cast %158 : vector<1x8x32xf32> to vector<8x32xf32>
    %160 = vector.shape_cast %157 : vector<8x32xf32> to vector<1x8x32xf32>
    tpu.vector_store %arg6[%c0_74, %c0_75, %c0_76], %160 {strides = array<i32>} : memref<1x8x32xf32, #tpu.memory_space<vmem>>, vector<1x8x32xf32>,
    return
  }
  func.func @transform_0(%arg0: i32, %arg1: i32) -> (i32, i32, i32) {
    %c0_i32 = arith.constant 0 : i32
    %c0_i32_0 = arith.constant 0 : i32
    %c0_i32_1 = arith.constant 0 : i32
    return %arg0, %c0_i32, %c0_i32_0 : i32, i32, i32
  }
  func.func @transform_1(%arg0: i32, %arg1: i32) -> (i32, i32) {
    %c0_i32 = arith.constant 0 : i32
    %c0_i32_0 = arith.constant 0 : i32
    %c0_i32_1 = arith.constant 0 : i32
    return %c0_i32, %c0_i32_0 : i32, i32
  }
  func.func @transform_2(%arg0: i32, %arg1: i32) -> (i32, i32) {
    %c0_i32 = arith.constant 0 : i32
    %c0_i32_0 = arith.constant 0 : i32
    %c0_i32_1 = arith.constant 0 : i32
    return %c0_i32, %c0_i32_0 : i32, i32
  }
  func.func @transform_3(%arg0: i32, %arg1: i32) -> (i32, i32) {
    %c0_i32 = arith.constant 0 : i32
    %c0_i32_0 = arith.constant 0 : i32
    %c0_i32_1 = arith.constant 0 : i32
    return %c0_i32, %c0_i32_0 : i32, i32
  }
  func.func @transform_4(%arg0: i32, %arg1: i32) -> (i32, i32, i32) {
    %c0_i32 = arith.constant 0 : i32
    %c0_i32_0 = arith.constant 0 : i32
    return %arg0, %arg1, %c0_i32 : i32, i32, i32
  }
}

</mosaic_0001>

<bundles_post_ra>
// kernel: tpu_custom_call.1
= control target key start
LH: loop header
LB: loop body
LE: loop exit
PB: predicated region body
PF: predicated region fallthrough
CT: control target
= control target key end

     0   :  { %9 = vsyncpa [#allocation5], 0  ;;  %s2679_s0 = inlined_call_operand.hbm [shape: bf16[2,8,32], index: 0, kind: input, shape index: {}]   ;;  %s2680_s1 = inlined_call_operand.hbm [shape: bf16[32,32], index: 1, kind: input, shape index: {}]   ;;  %s2681_s2 = inlined_call_operand.hbm [shape: bf16[32,64], index: 2, kind: input, shape index: {}]   ;;  %s2682_s3 = inlined_call_operand.hbm [shape: bf16[32,32], index: 3, kind: input, shape index: {}]   ;;  %s2683_s4 = inlined_call_operand.hbm [shape: f32[2,8,32], index: 4, kind: output, shape index: {}]  }
   0x1   :  { %11 = vsyncpa [#allocation5 + $0x1], 0 }
   0x2   :  { %12 = vsyncpa [#allocation8], 0 }
   0x3   :  { %13 = vsyncpa [#allocation11], 0 }
   0x4   :  { %14 = vsyncpa [#allocation6], 0 }
   0x5   :  { %16 = vsyncpa [#allocation6 + $0x1], 0  ;;  %s2225_s15 = smov 0   ;;  %s2227_s16 = smov 0  }
   0x6   :  { %s2229_s17 = smov 0   ;;  %s2231_s18 = smov 0  }
   0x7   :  { %s2233_s19 = smov 0   ;;  %s2235_s20 = smov 0  }
   0x8 LB: > { %s1571_s21 = sadd.s32 4294967295, %s2167_s20   ;;  %s1572_s22 = sadd.s32 4294967294, %s2167_s20   ;;  %s2167_s20 = sphi %s2235_s20, %s22_s20   ;;  %s2163_s19 = sphi %s2233_s19, %s2710_s19   ;;  %s2159_s18 = sphi %s2231_s18, %s2709_s18   ;;  %s2155_s17 = sphi %s2229_s17, %s2708_s17   ;;  %s2151_s16 = sphi %s2227_s16, %s2707_s16   ;;  %s2147_s15 = sphi %s2225_s15, %s2706_s15  }
   0x9   : > { %p54_p0 = scmp.ne.s32.totalorder %s2151_s16, %s2147_s15  ;;  %p2259_p1 = scmp.eq.s32.totalorder %s1571_s21, 0 }
   0xa   : > { %p2263_p2 = scmp.eq.s32.totalorder %s1571_s21, 1  ;;  %p149_p3 = scmp.eq.s32.totalorder %s1572_s22, 1 }
   0xb   : > { %s2689_s23 = scalar_select %p2259_p1, 1, 0 }
   0xc   : > { %s2690_s24 = scalar_select %p2263_p2, 1, 0 }
   0xd   : > { %p2269_p4 = por %p2259_p1, %p54_p0  ;;  %p1573_p5 = scmp.ge.s32.totalorder %s2167_s20, 1 }
   0xe   : > { %p2274_p6 = por %p149_p3, %p54_p0  ;;  %p156_p7 = scmp.lt.s32.totalorder %s2167_s20, 3 }
   0xf   : > { %s2691_s25 = scalar_select %p2269_p4, 1, 0 }
  0x10   : > { %s2692_s26 = scalar_select %p2274_p6, 1, 0 }
  0x11   : > { %p2279_p8 = pnand %p1573_p5, %p156_p7  ;;  %s2169_s28 = smov [#allocation7]  }
  0x12   : > { %2693 = sst [smem:[#allocation17_spill]] %s2692_s26  ;;  %s168_s29 = sshll.u32 %s2169_s28, 4  ;;  %s2283_s29 = int_to_ptr.vmem [resolvable:$true] %s168_s29 }
  0x13   : > { %s2694_s27 = scalar_select %p2279_p8, 1, 0 }
  0x14   : > { %p1814_p9 = pneg %p2279_p8  ;;  %s2170_s5 = smov [#allocation9]  }
  0x15   : > { %s181_s6 = sshll.u32 %s2170_s5, 4  ;;  %s2171_s7 = smov [#allocation10]   ;;  %s2294_s6 = int_to_ptr.vmem [resolvable:$true] %s181_s6 }
  0x16   : > { %p2290_p11 = pnand %p1814_p9, %p2259_p1  ;;  %s2296_s8 = sshll.u32 %s2171_s7, 4  ;;  %s195_s8 = int_to_ptr.vmem [resolvable:$true] %s2296_s8 }
  0x17   : > { %s1963_s11 = scalar_lea.hbm %s2680_s1, 256 }
  0x18   : > { %p1964_p12 = scmp.ne.s32.totalorder %s2680_s1, %s1963_s11  ;;  %p2306_p13 = pneg %p2290_p11 }
  0x19   : > { %p1970_p5 = scmp.lt.u32.totalorder %s1963_s11, %s2680_s1 }
  0x1a   : > { %p1966_p0 = pnand %p2306_p13, %p1964_p12 }
  0x1c   : > { %p1967_p3 = pneg %p1966_p0 }
  0x1e   : > { %p1972_p7 = pnand %p1970_p5, %p1967_p3 }
  0x20   : > { %1975 = shalt.err (!%p1972_p7)
}
  0x21   : > { %s1976_s28 = scalar_lea.vmem %s2283_s29, 256  ;;  %p1984_p1 = scmp.lt.s32.totalorder %s2283_s29, %s2283_s29 }
  0x22   : > { %p1977_p9 = scmp.ne.s32.totalorder %s2283_s29, %s1976_s28  ;;  %p1985_p4 = scmp.lt.s32.totalorder %s1976_s28, %s1976_s28 }
  0x24   : > { %p1979_p10 = pnand %p1977_p9, %p2306_p13  ;;  %p1986_p12 = por %p1985_p4, %p1984_p1 }
  0x26   : > { %p1980_p6 = pneg %p1979_p10 }
  0x28   : > { %p1987_p0 = pnand %p1986_p12, %p1980_p6 }
  0x2a   : > { %1990 = shalt.err (!%p1987_p0)
}
  0x2b   : > { %s2172_s5 = smov 64   ;;  %s2173_s7 = smov 4  }
  0x2c   : > { %1817 = dma.hbm_to_vmem [thread:$0]  (!%p2290_p11), %s2680_s1, 256, %s2283_s29, [#allocation8], %s2172_s5, %s2172_s5, %s2173_s7  }
  0x2d   : > { %s1991_s13 = scalar_lea.hbm %s2681_s2, 256 }
  0x2e   : > { %p1992_p1 = scmp.ne.s32.totalorder %s2681_s2, %s1991_s13  ;;  %p1998_p10 = scmp.lt.u32.totalorder %s1991_s13, %s2681_s2 }
  0x30   : > { %p1994_p4 = pnand %p1992_p1, %p2306_p13 }
  0x32   : > { %p1995_p6 = pneg %p1994_p4 }
  0x34   : > { %p2000_p3 = pnand %p1998_p10, %p1995_p6 }
  0x36   : > { %2003 = shalt.err (!%p2000_p3)
}
  0x37   : > { %s2004_s29 = scalar_lea.vmem %s2294_s6, 256  ;;  %p2012_p12 = scmp.lt.s32.totalorder %s2294_s6, %s2294_s6 }
  0x38   : > { %p2005_p5 = scmp.ne.s32.totalorder %s2294_s6, %s2004_s29  ;;  %p2013_p0 = scmp.lt.s32.totalorder %s2004_s29, %s2004_s29 }
  0x3a   : > { %p2007_p7 = pnand %p2005_p5, %p2306_p13  ;;  %p2014_p1 = por %p2013_p0, %p2012_p12 }
  0x3c   : > { %p2008_p9 = pneg %p2007_p7 }
  0x3e   : > { %p2015_p4 = pnand %p2014_p1, %p2008_p9 }
  0x40   : > { %2018 = shalt.err (!%p2015_p4)
}
  0x41   : > { %1820 = dma.hbm_to_vmem [thread:$0]  (!%p2290_p11), %s2681_s2, 256, %s2294_s6, [#allocation8], %s2172_s5, %s2172_s5, %s2173_s7  }
  0x42   : > { %s2019_s12 = scalar_lea.hbm %s2682_s3, 256 }
  0x43   : > { %p2020_p6 = scmp.ne.s32.totalorder %s2682_s3, %s2019_s12  ;;  %p2026_p5 = scmp.lt.u32.totalorder %s2019_s12, %s2682_s3 }
  0x45   : > { %p2022_p10 = pnand %p2020_p6, %p2306_p13 }
  0x47   : > { %p2023_p3 = pneg %p2022_p10 }
  0x49   : > { %p2028_p7 = pnand %p2026_p5, %p2023_p3 }
  0x4b   : > { %2031 = shalt.err (!%p2028_p7)
}
  0x4c   : > { %s2032_s29 = scalar_lea.vmem %s195_s8, 256  ;;  %p2040_p1 = scmp.lt.s32.totalorder %s195_s8, %s195_s8 }
  0x4d   : > { %p2033_p9 = scmp.ne.s32.totalorder %s195_s8, %s2032_s29  ;;  %p2041_p4 = scmp.lt.s32.totalorder %s2032_s29, %s2032_s29 }
  0x4f   : > { %p2035_p12 = pnand %p2033_p9, %p2306_p13  ;;  %p2042_p8 = por %p2041_p4, %p2040_p1 }
  0x51   : > { %p2036_p0 = pneg %p2035_p12 }
  0x53   : > { %p2043_p2 = pnand %p2042_p8, %p2036_p0 }
  0x55   : > { %2046 = shalt.err (!%p2043_p2)
}
  0x56   : > { %1823 = dma.hbm_to_vmem [thread:$0]  (!%p2290_p11), %s2682_s3, 256, %s195_s8, [#allocation11], %s2172_s5, %s2172_s5, %s2173_s7  }
  0x57   : > { %s41_s14 = sadd.s32 1, %s2155_s17  ;;  %s34_s30 = sadd.s32 1, %s2163_s19 }
  0x58   : > { %p48_p2 = scmp.ne.s32.totalorder %s2155_s17, %s2151_s16  ;;  %p36_p8 = scmp.ge.s32.totalorder %s34_s30, 2 }
  0x59   : > { %p49_p13 = scmp.eq.s32.totalorder %s2167_s20, 0  ;;  %p2697_p6 = scmp.ne.s32.totalorder %s2690_s24, 0 }
  0x5a   : > { %p1835_p3 = scmp.lt.s32.totalorder %s2167_s20, 2  ;;  %s2712_s30 = smov (%p36_p8, %s34_s30), 0 }
  0x5b   : > { %p2385_p10 = por %p2697_p6, %p48_p2  ;;  %p50_p5 = por %p49_p13, %p48_p2 }
  0x5c   : > { %s208_s10 = sand.u32 1, %s2155_s17   ;;  %s38_s11 = ssub.s32 %s2163_s19, %s2712_s30 }
  0x5d   : > { %p39_p7 = scmp.eq.s32.totalorder %s38_s11, 0  ;;  %s1578_s8 = sshll.u32 %s208_s10, 2 }
  0x5e   : > { %s1579_s5 = sshll.u32 %s2163_s19, 6  ;;  %s212_s21 = scalar_lea.vmem [#allocation4], %s1578_s8 }
  0x5f   : > { %s2397_s7 = scalar_select %p39_p7, %s2155_s17, %s41_s14  }
  0x60   : > { %s2402_s24 = scalar_lea.hbm %s2679_s0, %s1579_s5  ;;  %s219_s22 = sshll.u32 %s212_s21, 4  ;;  %s2404_s22 = int_to_ptr.vmem [resolvable:$true] %s219_s22 }
  0x61   : > { %p2408_p11 = pnand %p1835_p3, %p50_p5  ;;  %s209_s29 = scalar_lea.sflag [#allocation5], %s208_s10 }
  0x62   : > { %s2047_s6 = scalar_lea.hbm %s2402_s24, 64  ;;  %s2052_s11 = scalar_lea.hbm %s2679_s0, 128 }
  0x63   : > { %p2048_p9 = scmp.ne.s32.totalorder %s2402_s24, %s2047_s6  ;;  %p2049_p12 = pneg %p2408_p11 }
  0x64   : > { %p2053_p4 = scmp.lt.u32.totalorder %s2402_s24, %s2679_s0  ;;  %p2054_p2 = scmp.lt.u32.totalorder %s2052_s11, %s2047_s6 }
  0x65   : > { %p2050_p0 = pnand %p2049_p12, %p2048_p9  ;;  %p2056_p13 = scmp.lt.u32.totalorder %s2047_s6, %s2402_s24 }
  0x66   : > { %p2055_p8 = por %p2054_p2, %p2053_p4 }
  0x67   : > { %p2051_p1 = pneg %p2050_p0 }
  0x68   : > { %p2057_p6 = por %p2056_p13, %p2055_p8 }
  0x6a   : > { %p2058_p3 = pnand %p2057_p6, %p2051_p1 }
  0x6c   : > { %2061 = shalt.err (!%p2058_p3)
}
  0x6d   : > { %s2062_s10 = scalar_lea.vmem %s2404_s22, 64  ;;  %s2174_s12 = smov [#allocation4]  }
  0x6e   : > { %p2063_p5 = scmp.ne.s32.totalorder %s2404_s22, %s2062_s10  ;;  %s2067_s13 = sshll.u32 %s2174_s12, 4  ;;  %s2068_s13 = int_to_ptr.vmem [resolvable:$false] %s2067_s13 }
  0x6f   : > { %s2069_s21 = scalar_lea.vmem %s2068_s13, 128  ;;  %p2070_p0 = scmp.lt.s32.totalorder %s2404_s22, %s2068_s13 }
  0x70   : > { %p2065_p7 = pnand %p2063_p5, %p2049_p12  ;;  %p2071_p4 = scmp.lt.s32.totalorder %s2069_s21, %s2062_s10 }
  0x72   : > { %p2066_p9 = pneg %p2065_p7  ;;  %p2072_p2 = por %p2071_p4, %p2070_p0 }
  0x74   : > { %p2073_p8 = pnand %p2072_p2, %p2066_p9 }
  0x76   : > { %2076 = shalt.err (!%p2073_p8)
}
  0x77   : > { %1827 = dma.hbm_to_vmem [thread:$0]  (!%p2408_p11), %s2402_s24, 64, %s2404_s22, %s209_s29  }
  0x78   : > { %p2700_p1 = scmp.ne.s32.totalorder %s2694_s27, 0 }
  0x79   : > { %s2440_s6 = sand.u32 (!%p2700_p1), 1, %s2151_s16   ;;  %p2701_p12 = scmp.ne.s32.totalorder (!%p2700_p1), %s2691_s25, 0 }
  0x7a   : > { %228 = sbr.rel (%p2700_p1) target bundleno = 1499 (0x5db), region = 36  ;;  %s1581_s26 = sshll.u32 (!%p2700_p1), %s2440_s6, 2 }
  0x7b   : > { %s231_s14 = scalar_lea.sflag (!%p2700_p1), [#allocation5], %s2440_s6  ;;  %s234_s11 = scalar_lea.vmem (!%p2700_p1), [#allocation4], %s1581_s26 }
  0x81   : > { %2130 = dma.done.wait (%p2701_p12), %s231_s14, 64  }
  0x82   : > { %2132 = vsyncadd (%p2701_p12), %s231_s14, 4294967232  ;;  %p2702_p13 = scmp.ne.s32.totalorder %s2689_s23, 0 }
  0x84   : > { %2134 = dma.done.wait (%p2702_p13), [#allocation8], 512  }
  0x85   : > { %2136 = vsyncadd (%p2702_p13), [#allocation8], 4294966784 }
  0x86   : > { %2138 = dma.done.wait (%p2702_p13), [#allocation11], 256  }
  0x87   : > { %2140 = vsyncadd (%p2702_p13), [#allocation11], 4294967040  ;;  %v2175_v0 = vmov 0.0   ;;  %vm2176_vm0 = vmmov 0   ;;  %v1917_v1 = vld [vmem:[#allocation9] sm:$0xff]   ;;  %v1918_v2 = vld [vmem:[#allocation9 + $0x8] sm:$0xff]  }
  0x88   : > { %1678 = vmatprep.subr.bf16.mxu0 %v2175_v0  ;;  %1682 = vmatprep.mubr.msk.bf16.mxu0 %vm2176_vm0, %v2175_v0  ;;  %v1919_v3 = vld [vmem:[#allocation7] sm:$0xff]   ;;  %v1920_v4 = vld [vmem:[#allocation7 + $0x8] sm:$0xff]   ;;  %v276_v5 = vld [vmem:[%s234_s11] sm:$0xf]  ;;  %vm293_vm1 = vcmask 261120   ;;  %vm338_vm2 = vcmask 519168  }
  0x89   : > { %1686 = vmatprep.subr.bf16.mxu1 %v2175_v0  ;;  %1690 = vmatprep.mubr.msk.bf16.mxu1 %vm2176_vm0, %v2175_v0  ;;  %v345_v6 = vld [vmem:[%s234_s11] sm:$0xf]  ;;  %vm408_vm3 = vcmask 31744   ;;  %s2177_s23 = smov 120   ;;  %s2178_s25 = smov 124   ;;  %vm474_vm4 = vcmask 1043456  }
  0x8a   : > { %1679 = vmatpush3.bf16.msra.mxu0 %v1917_v1  ;;  %1687 = vmatpush3.bf16.msra.mxu1 %v1919_v3  ;;  %s2179_s27 = smov 116   ;;  %s2180_s24 = smov 112   ;;  %vm455_vm5 = vcmask 64512   ;;  %vm521_vm6 = vcmask 27648   ;;  %vm645_vm7 = vcmask 60448   ;;  %vm768_vm8 = vcmask 93248  }
  0x8b   : > { %1680 = vmatprep.subr.bf16.mxu0 %v2175_v0  ;;  %1688 = vmatprep.subr.bf16.mxu1 %v2175_v0  ;;  %s2181_s22 = smov 108   ;;  %s2182_s28 = smov 104   ;;  %vm891_vm9 = vcmask 126048   ;;  %vm1014_vm10 = vcmask 158848   ;;  %vm1137_vm11 = vcmask 191648   ;;  %vm1260_vm12 = vcmask 224448  }
  0x8c   : > { %s2183_s29 = smov 100   ;;  %s2184_s8 = smov 96   ;;  %vm1383_vm13 = vcmask 257248  }
  0x8d   : > { %s2185_s5 = smov 92   ;;  %s2186_s10 = smov 88  }
  0x8e   : > { %1681 = vmatpush3.bf16.msra.mxu0 %v1918_v2  ;;  %1689 = vmatpush3.bf16.msra.mxu1 %v1920_v4  ;;  %s2187_s12 = smov 84   ;;  %s2188_s13 = smov 76  }
  0x8f   : > { %1694 = vmatprep.subr.bf16.mxu0 %v2175_v0  ;;  %1700 = vmatprep.subr.bf16.mxu1 %v2175_v0  ;;  %s2189_s21 = smov 80   ;;  %s2190_s26 = smov 72  }
  0x90   : > { %s2191_s14 = smov 68   ;;  %s2192_s11 = smov 4  }
  0x91   : > { %1683 = vmatmul.mubr.msk.bf16.vlgmr.msra.gmra.mrb[0].mxu0 %vm293_vm1, %v276_v5  ;;  %1691 = vmatmul.mubr.msk.bf16.vlgmr.msra.gmra.mrb[0].mxu1 %vm293_vm1, %v345_v6 }
  0x92   : > { %1696 = vmatprep.mubr.msk.bf16.mxu0 %vm2176_vm0, %v2175_v0  ;;  %1702 = vmatprep.mubr.msk.bf16.mxu1 %vm2176_vm0, %v2175_v0 }
 0x164   : > { %v331_v7 = vpop.f32.mrb[0].mxu0  ;;  %v400_v12 = vpop.f32.mrb[0].mxu1 }
 0x165   : > { %v337_v8 = vpack.c.bf16 %v331_v7, %v331_v7  ;;  %v1684_v9 = vpop.f32.mrb[1].mxu0  ;;  %v1692_v13 = vpop.f32.mrb[1].mxu1  ;;  %v406_v20 = vpack.c.bf16 %v400_v12, %v400_v12 }
 0x166   : > { %v334_v10 = vpop.f32.mrb[2].mxu0  ;;  %v403_v14 = vpop.f32.mrb[2].mxu1 }
 0x167   : > { %339 = vst.msk [vmem:[#allocation2] sm:$0xf] %vm338_vm2, %v337_v8  ;;  %v1685_v11 = vpop.f32.mrb[3].mxu0  ;;  %v1693_v15 = vpop.f32.mrb[3].mxu1 }
 0x16e   : > { %v407_v16 = vld [vmem:[#allocation2] sm:$0xf] }
 0x16f   : > { %v2472_v17 = vld [vmem:[#allocation2] ss:$0 sps:$4 sm:$0xff]   ;;  %v413_v18 = vsel %vm408_vm3, %v407_v16, 0  ;;  %v1593_v26 = vcombine.low %v407_v16, %v407_v16 }
 0x170   : > { %v1922_v19 = vld [vmem:[#allocation2] ss:$0 sps:$4 sm:$0xff]   ;;  %1695 = vmatpush3.bf16.xpose.msra.mxu0 %v413_v18  ;;  %653 = vrot.lane.b32.xlu1 %v2472_v17, %s2177_s23 }
 0x171   : > { %530 = vrot.lane.b32.xlu0 %v1922_v19, %s2178_s25  ;;  %1706 = vmatprep.subr.bf16.mxu0 %v2175_v0  ;;  %v2478_v21 = vld [vmem:[#allocation2] ss:$0 sps:$4 sm:$0xff]  }
 0x172   : > { %v2483_v22 = vld [vmem:[#allocation2] ss:$0 sps:$4 sm:$0xff]  }
 0x173   : > { %v2486_v23 = vld [vmem:[#allocation2] ss:$0 sps:$4 sm:$0xff]  }
 0x174   : > { %648 = vrot.lane.b32.xlu1 %v406_v20, %s2177_s23  ;;  %v2489_v24 = vld [vmem:[#allocation2] ss:$0 sps:$4 sm:$0xff]   ;;  %s2193_s23 = smov 8  }
 0x175   : > { %525 = vrot.lane.b32.xlu0 %v406_v20, %s2178_s25  ;;  %v2492_v25 = vld [vmem:[#allocation2] ss:$0 sps:$4 sm:$0xff]   ;;  %s2194_s25 = smov 12  }
 0x177   : > { %1697 = vmatmul.mubr.msk.bf16.vlgmr.msra.gmra.mrb[4].mxu0 %vm408_vm3, %v406_v20 }
 0x178   : > { %771 = vrot.lane.b32.xlu1 %v406_v20, %s2179_s27  ;;  %1708 = vmatprep.mubr.msk.bf16.mxu0 %vm2176_vm0, %v2175_v0 }
 0x179   : > { %776 = vrot.lane.b32.xlu0 %v2478_v21, %s2179_s27  ;;  %s2195_s27 = smov 16  }
 0x17c   : > { %894 = vrot.lane.b32.xlu1 %v406_v20, %s2180_s24 }
 0x17d   : > { %899 = vrot.lane.b32.xlu0 %v2483_v22, %s2180_s24  ;;  %s2196_s24 = smov 20  }
 0x180   : > { %1017 = vrot.lane.b32.xlu1 %v406_v20, %s2181_s22 }
 0x181   : > { %1022 = vrot.lane.b32.xlu0 %v2486_v23, %s2181_s22  ;;  %s2197_s22 = smov 24  }
 0x184   : > { %1140 = vrot.lane.b32.xlu1 %v406_v20, %s2182_s28 }
 0x185   : > { %1145 = vrot.lane.b32.xlu0 %v2489_v24, %s2182_s28  ;;  %s2198_s28 = smov 28  }
 0x188   : > { %1263 = vrot.lane.b32.xlu1 %v406_v20, %s2183_s29 }
 0x189   : > { %1268 = vrot.lane.b32.xlu0 %v2492_v25, %s2183_s29  ;;  %s1585_s29 = sshll.u32 %s2440_s6, 3 }
 0x18c   : > { %469 = vrot.lane.b32.xlu1 %v1593_v26, %s2184_s8  ;;  %s1627_s8 = sshll.u32 %s2159_s18, 7  ;;  %s2199_s18 = smov [#allocation12]  }
 0x18d   : > { %588 = vrot.lane.b32.xlu0 %v1922_v19, %s2185_s5  ;;  %s270_s5 = scalar_lea.vmem [#allocation12], %s1585_s29 }
 0x1e2   : > { %v654_v27 = vpop.permute.xlu1 %653 }
 0x1e3   : > { %v531_v28 = vpop.permute.xlu0 %530  ;;  %v659_v33 = vsel %vm408_vm3, %v654_v27, 0 }
 0x1e4   : > { %v536_v29 = vsel %vm408_vm3, %v531_v28, 0 }
 0x1e5   : > { %1707 = vmatpush3.bf16.xpose.msra.mxu0 %v536_v29 }
 0x1e6   : > { %v649_v30 = vpop.permute.xlu1 %648  ;;  %1718 = vmatprep.subr.bf16.mxu0 %v2175_v0 }
 0x1e7   : > { %v526_v32 = vpop.permute.xlu0 %525 }
 0x1ea   : > { %v772_v31 = vpop.permute.xlu1 %771 }
 0x1eb   : > { %v777_v35 = vpop.permute.xlu0 %776 }
 0x1ec   : > { %1709 = vmatmul.mubr.msk.bf16.vlgmr.msra.gmra.mrb[8].mxu0 %vm408_vm3, %v526_v32  ;;  %v782_v37 = vsel %vm408_vm3, %v777_v35, 0 }
 0x1ed   : > { %1719 = vmatpush3.bf16.xpose.msra.mxu0 %v659_v33  ;;  %1720 = vmatprep.mubr.msk.bf16.mxu0 %vm2176_vm0, %v2175_v0 }
 0x1ee   : > { %v895_v34 = vpop.permute.xlu1 %894  ;;  %1730 = vmatprep.subr.bf16.mxu0 %v2175_v0 }
 0x1ef   : > { %v900_v39 = vpop.permute.xlu0 %899 }
 0x1f0   : > { %v905_v41 = vsel %vm408_vm3, %v900_v39, 0 }
 0x1f2   : > { %v1018_v36 = vpop.permute.xlu1 %1017 }
 0x1f3   : > { %v1023_v44 = vpop.permute.xlu0 %1022 }
 0x1f4   : > { %1721 = vmatmul.mubr.msk.bf16.vlgmr.msra.gmra.mrb[12].mxu0 %vm408_vm3, %v649_v30  ;;  %v1028_v45 = vsel %vm408_vm3, %v1023_v44, 0 }
 0x1f5   : > { %1731 = vmatpush3.bf16.xpose.msra.mxu0 %v782_v37  ;;  %1732 = vmatprep.mubr.msk.bf16.mxu0 %vm2176_vm0, %v2175_v0 }
 0x1f6   : > { %v1141_v38 = vpop.permute.xlu1 %1140  ;;  %1742 = vmatprep.subr.bf16.mxu0 %v2175_v0 }
 0x1f7   : > { %v1146_v46 = vpop.permute.xlu0 %1145 }
 0x1f8   : > { %v1151_v47 = vsel %vm408_vm3, %v1146_v46, 0 }
 0x1fa   : > { %v1264_v40 = vpop.permute.xlu1 %1263 }
 0x1fb   : > { %v1269_v48 = vpop.permute.xlu0 %1268 }
 0x1fc   : > { %1733 = vmatmul.mubr.msk.bf16.vlgmr.msra.gmra.mrb[16].mxu0 %vm408_vm3, %v772_v31  ;;  %v1274_v49 = vsel %vm408_vm3, %v1269_v48, 0 }
 0x1fd   : > { %1743 = vmatpush3.bf16.xpose.msra.mxu0 %v905_v41  ;;  %1744 = vmatprep.mubr.msk.bf16.mxu0 %vm2176_vm0, %v2175_v0 }
 0x1fe   : > { %v470_v42 = vpop.permute.xlu1 %469  ;;  %1754 = vmatprep.subr.bf16.mxu0 %v2175_v0 }
 0x1ff   : > { %v476_v43 = vsel %vm474_vm4, %v470_v42, 0  ;;  %v589_v7 = vpop.permute.xlu0 %588 }
 0x200   : > { %1701 = vmatpush3.bf16.msra.mxu1 %v476_v43  ;;  %v594_v31 = vsel %vm474_vm4, %v589_v7, 0 }
 0x201   : > { %1712 = vmatprep.subr.bf16.mxu1 %v2175_v0 }
 0x204   : > { %1745 = vmatmul.mubr.msk.bf16.vlgmr.msra.gmra.mrb[20].mxu0 %vm408_vm3, %v895_v34 }
 0x205   : > { %1755 = vmatpush3.bf16.xpose.msra.mxu0 %v1028_v45  ;;  %1756 = vmatprep.mubr.msk.bf16.mxu0 %vm2176_vm0, %v2175_v0 }
 0x206   : > { %1766 = vmatprep.subr.bf16.mxu0 %v2175_v0 }
 0x20c   : > { %1757 = vmatmul.mubr.msk.bf16.vlgmr.msra.gmra.mrb[24].mxu0 %vm408_vm3, %v1018_v36 }
 0x20d   : > { %1767 = vmatpush3.bf16.xpose.msra.mxu0 %v1151_v47  ;;  %1768 = vmatprep.mubr.msk.bf16.mxu0 %vm2176_vm0, %v2175_v0 }
 0x20e   : > { %1778 = vmatprep.subr.bf16.mxu0 %v2175_v0 }
 0x214   : > { %1769 = vmatmul.mubr.msk.bf16.vlgmr.msra.gmra.mrb[28].mxu0 %vm408_vm3, %v1141_v38 }
 0x215   : > { %1779 = vmatpush3.bf16.xpose.msra.mxu0 %v1274_v49  ;;  %1780 = vmatprep.mubr.msk.bf16.mxu0 %vm2176_vm0, %v2175_v0 }
 0x216   : > { %1790 = vmatprep.subr.bf16.mxu0 %v2175_v0 }
 0x21c   : > { %1781 = vmatmul.mubr.msk.bf16.vlgmr.msra.gmra.mrb[32].mxu0 %vm408_vm3, %v1264_v40 }
 0x21d   : > { %1794 = vmatprep.mubr.msk.bf16.mxu0 %vm2176_vm0, %v2175_v0 }
 0x24a   : > { %v449_v50 = vpop.f32.mrb[4].mxu0 }
 0x24b   : > { %v1698_v51 = vpop.f32.mrb[5].mxu0  ;;  %v456_v52 = vsel %vm455_vm5, %v449_v50, -inf }
 0x24c   : > { %457 = vmax.xlane.f32.xlu0 %v456_v52  ;;  %v452_v53 = vpop.f32.mrb[6].mxu0 }
 0x24d   : > { %v1699_v54 = vpop.f32.mrb[7].mxu0 }
 0x262   : > { %711 = vrot.lane.b32.xlu0 %v2472_v17, %s2186_s10  ;;  %s1461_s10 = sshll.u32 %s270_s5, 4  ;;  %s2631_s10 = int_to_ptr.vmem [resolvable:$true] %s1461_s10 }
 0x2bf   : > { %v2534_v55 = vpop.f32.mrb[8].mxu0 }
 0x2c0   : > { %v1710_v56 = vpop.f32.mrb[9].mxu0  ;;  %v578_v57 = vsel %vm455_vm5, %v2534_v55, -inf }
 0x2c1   : > { %579 = vmax.xlane.f32.xlu1 %v578_v57  ;;  %v575_v58 = vpop.f32.mrb[10].mxu0 }
 0x2c2   : > { %v1711_v59 = vpop.f32.mrb[11].mxu0 }
 0x2c7   : > { %v2538_v60 = vpop.f32.mrb[12].mxu0 }
 0x2c8   : > { %v1722_v61 = vpop.f32.mrb[13].mxu0  ;;  %v701_v62 = vsel %vm455_vm5, %v2538_v60, -inf }
 0x2c9   : > { %702 = vmax.xlane.f32.xlu0 %v701_v62  ;;  %v698_v63 = vpop.f32.mrb[14].mxu0 }
 0x2ca   : > { %v1723_v1 = vpop.f32.mrb[15].mxu0 }
 0x2cf   : > { %v2542_v2 = vpop.f32.mrb[16].mxu0 }
 0x2d0   : > { %v1734_v3 = vpop.f32.mrb[17].mxu0  ;;  %v824_v4 = vsel %vm455_vm5, %v2542_v2, -inf }
 0x2d1   : > { %825 = vmax.xlane.f32.xlu0 %v824_v4  ;;  %v821_v5 = vpop.f32.mrb[18].mxu0 }
 0x2d2   : > { %834 = vrot.lane.b32.xlu1 %v2478_v21, %s2187_s12  ;;  %v1735_v6 = vpop.f32.mrb[19].mxu0 }
 0x2d7   : > { %v2547_v8 = vpop.f32.mrb[20].mxu0 }
 0x2d8   : > { %v1746_v9 = vpop.f32.mrb[21].mxu0  ;;  %v947_v10 = vsel %vm455_vm5, %v2547_v8, -inf }
 0x2d9   : > { %v458_v11 = vpop.xlane.xlu0 %457  ;;  %948 = vmax.xlane.f32.xlu0 %v947_v10  ;;  %v944_v12 = vpop.f32.mrb[22].mxu0 }
 0x2da   : > { %v459_v13 = vsub.f32 %v449_v50, %v458_v11  ;;  %v1747_v14 = vpop.f32.mrb[23].mxu0 }
 0x2dc   : > { %v460_v15 = vmul.f32 1.442695, %v459_v13 }
 0x2dd   : > { %v712_v41 = vpop.permute.xlu0 %711 }
 0x2de   : > { %1931 = vpow2.f32 %v460_v15 }
 0x2df   : > { %v2551_v16 = vpop.f32.mrb[24].mxu0 }
 0x2e0   : > { %v1758_v17 = vpop.f32.mrb[25].mxu0  ;;  %v1070_v37 = vsel %vm455_vm5, %v2551_v16, -inf }
 0x2e1   : > { %v1067_v18 = vpop.f32.mrb[26].mxu0 }
 0x2e2   : > { %v1759_v19 = vpop.f32.mrb[27].mxu0 }
 0x2e7   : > { %v2553_v20 = vpop.f32.mrb[28].mxu0 }
 0x2e8   : > { %v2555_v21 = vpop.eup %1931  ;;  %v1770_v26 = vpop.f32.mrb[29].mxu0  ;;  %v1193_v27 = vsel %vm455_vm5, %v2553_v20, -inf }
 0x2e9   : > { %1194 = vmax.xlane.f32.xlu0 %v1193_v27  ;;  %v1190_v28 = vpop.f32.mrb[30].mxu0  ;;  %v465_v29 = vpack.c.bf16 %v2555_v21, %v2555_v21  ;;  %v462_v14 = vsel %vm455_vm5, %v2555_v21, 0.0 }
 0x2ea   : > { %v1771_v30 = vpop.f32.mrb[31].mxu0 }
 0x2eb   : > { %1703 = vmatmul.mubr.msk.bf16.vlgmr.msra.gmra.mrb[4].mxu1 %vm455_vm5, %v465_v29 }
 0x2ec   : > { %1713 = vmatpush3.bf16.msra.mxu1 %v594_v31  ;;  %1714 = vmatprep.mubr.msk.bf16.mxu1 %vm2176_vm0, %v2175_v0 }
 0x2ed   : > { %1724 = vmatprep.subr.bf16.mxu1 %v2175_v0 }
 0x2ef   : > { %v2566_v32 = vpop.f32.mrb[32].mxu0 }
 0x2f0   : > { %v1782_v33 = vpop.f32.mrb[33].mxu0  ;;  %v1316_v34 = vsel %vm455_vm5, %v2566_v32, -inf }
 0x2f1   : > { %1317 = vmax.xlane.f32.xlu0 %v1316_v34  ;;  %v1313_v35 = vpop.f32.mrb[34].mxu0 }
 0x2f2   : > { %v1783_v36 = vpop.f32.mrb[35].mxu0 }
 0x2f6   : > { %1071 = vmax.xlane.f32.xlu1 %v1070_v37 }
 0x307   : > { %1080 = vrot.lane.b32.xlu1 %v2486_v23, %s2188_s13  ;;  %957 = vrot.lane.b32.xlu0 %v2483_v22, %s2189_s21  ;;  %s2629_s21 = scalar_lea.hbm %s2683_s4, %s1627_s8 }
 0x30b   : > { %1203 = vrot.lane.b32.xlu1 %v2489_v24, %s2190_s26  ;;  %s1447_s26 = scalar_lea.sflag [#allocation6], %s2440_s6 }
 0x30f   : > { %1326 = vrot.lane.b32.xlu1 %v2492_v25, %s2191_s14  ;;  %v717_v25 = vsel %vm474_vm4, %v712_v41, 0  ;;  %s2077_s14 = scalar_lea.vmem %s2631_s10, 128 }
 0x310   : > { %p2078_p11 = scmp.ne.s32.totalorder %s2631_s10, %s2077_s14 }
 0x312   : > { %p2079_p6 = pnand %p2078_p11, %p2385_p10 }
 0x314   : > { %p2080_p3 = pneg %p2079_p6 }
 0x34e   : > { %v580_v38 = vpop.xlane.xlu1 %579 }
 0x34f   : > { %v581_v39 = vsub.f32 %v2534_v55, %v580_v38 }
 0x351   : > { %v582_v40 = vmul.f32 1.442695, %v581_v39 }
 0x352   : > { %v835_v49 = vpop.permute.xlu1 %834 }
 0x353   : > { %1933 = vpow2.f32 %v582_v40  ;;  %v840_v54 = vsel %vm474_vm4, %v835_v49, 0 }
 0x356   : > { %v703_v42 = vpop.xlane.xlu0 %702 }
 0x357   : > { %v704_v43 = vsub.f32 %v2538_v60, %v703_v42 }
 0x359   : > { %v705_v44 = vmul.f32 1.442695, %v704_v43 }
 0x35b   : > { %1935 = vpow2.f32 %v705_v44 }
 0x35d   : > { %v1934_v23 = vpop.eup %1933 }
 0x35e   : > { %v826_v45 = vpop.xlane.xlu0 %825  ;;  %v584_v22 = vsel %vm455_vm5, %v1934_v23, 0.0  ;;  %v587_v46 = vpack.c.bf16 %v1934_v23, %v1934_v23 }
 0x35f   : > { %v827_v24 = vsub.f32 %v2542_v2, %v826_v45  ;;  %585 = vadd.xlane.f32.xlu1 %v584_v22 }
 0x360   : > { %1715 = vmatmul.mubr.msk.bf16.vlgmr.msra.gmra.mrb[8].mxu1 %vm455_vm5, %v587_v46 }
 0x361   : > { %v828_v47 = vmul.f32 1.442695, %v827_v24  ;;  %1725 = vmatpush3.bf16.msra.mxu1 %v717_v25  ;;  %1726 = vmatprep.mubr.msk.bf16.mxu1 %vm2176_vm0, %v2175_v0 }
 0x362   : > { %1736 = vmatprep.subr.bf16.mxu1 %v2175_v0 }
 0x363   : > { %1937 = vpow2.f32 %v828_v47 }
 0x365   : > { %v1936_v48 = vpop.eup %1935 }
 0x366   : > { %v949_v50 = vpop.xlane.xlu0 %948  ;;  %v707_v51 = vsel %vm455_vm5, %v1936_v48, 0.0  ;;  %v710_v52 = vpack.c.bf16 %v1936_v48, %v1936_v48 }
 0x367   : > { %v950_v53 = vsub.f32 %v2547_v8, %v949_v50  ;;  %708 = vadd.xlane.f32.xlu0 %v707_v51 }
 0x368   : > { %1727 = vmatmul.mubr.msk.bf16.vlgmr.msra.gmra.mrb[12].mxu1 %vm455_vm5, %v710_v52 }
 0x369   : > { %v951_v55 = vmul.f32 1.442695, %v950_v53  ;;  %1737 = vmatpush3.bf16.msra.mxu1 %v840_v54  ;;  %1738 = vmatprep.mubr.msk.bf16.mxu1 %vm2176_vm0, %v2175_v0 }
 0x36a   : > { %1748 = vmatprep.subr.bf16.mxu1 %v2175_v0 }
 0x36b   : > { %1939 = vpow2.f32 %v951_v55 }
 0x36d   : > { %v1938_v56 = vpop.eup %1937 }
 0x36e   : > { %v830_v57 = vsel %vm455_vm5, %v1938_v56, 0.0  ;;  %v833_v58 = vpack.c.bf16 %v1938_v56, %v1938_v56 }
 0x36f   : > { %831 = vadd.xlane.f32.xlu1 %v830_v57 }
 0x370   : > { %1739 = vmatmul.mubr.msk.bf16.vlgmr.msra.gmra.mrb[16].mxu1 %vm455_vm5, %v833_v58 }
 0x371   : > { %1750 = vmatprep.mubr.msk.bf16.mxu1 %vm2176_vm0, %v2175_v0 }
 0x375   : > { %v1940_v59 = vpop.eup %1939 }
 0x376   : > { %v1195_v60 = vpop.xlane.xlu0 %1194  ;;  %v953_v61 = vsel %vm455_vm5, %v1940_v59, 0.0  ;;  %v956_v8 = vpack.c.bf16 %v1940_v59, %v1940_v59 }
 0x377   : > { %v1196_v62 = vsub.f32 %v2553_v20, %v1195_v60  ;;  %954 = vadd.xlane.f32.xlu0 %v953_v61 }
 0x379   : > { %v1197_v63 = vmul.f32 1.442695, %v1196_v62 }
 0x37b   : > { %1941 = vpow2.f32 %v1197_v63 }
 0x37e   : > { %v1318_v1 = vpop.xlane.xlu0 %1317 }
 0x37f   : > { %v1319_v2 = vsub.f32 %v2566_v32, %v1318_v1 }
 0x381   : > { %v1320_v9 = vmul.f32 1.442695, %v1319_v2 }
 0x382   : > { %v958_v3 = vpop.permute.xlu0 %957 }
 0x383   : > { %v963_v4 = vsel %vm474_vm4, %v958_v3, 0  ;;  %v1072_v5 = vpop.xlane.xlu1 %1071 }
 0x384   : > { %v1073_v6 = vsub.f32 %v2551_v16, %v1072_v5  ;;  %1749 = vmatpush3.bf16.msra.mxu1 %v963_v4 }
 0x385   : > { %v1942_v7 = vpop.eup %1941  ;;  %1760 = vmatprep.subr.bf16.mxu1 %v2175_v0 }
 0x386   : > { %v1074_v10 = vmul.f32 1.442695, %v1073_v6  ;;  %v1199_v11 = vsel %vm455_vm5, %v1942_v7, 0.0  ;;  %v1202_v27 = vpack.c.bf16 %v1942_v7, %v1942_v7 }
 0x387   : > { %v1081_v12 = vpop.permute.xlu1 %1080  ;;  %1200 = vadd.xlane.f32.xlu0 %v1199_v11  ;;  %1751 = vmatmul.mubr.msk.bf16.vlgmr.msra.gmra.mrb[20].mxu1 %vm455_vm5, %v956_v8 }
 0x388   : > { %1943 = vpow2.f32 %v1074_v10  ;;  %v1086_v13 = vsel %vm474_vm4, %v1081_v12, 0  ;;  %1762 = vmatprep.mubr.msk.bf16.mxu1 %vm2176_vm0, %v2175_v0 }
 0x389   : > { %1761 = vmatpush3.bf16.msra.mxu1 %v1086_v13  ;;  %1945 = vpow2.f32 %v1320_v9 }
 0x38a   : > { %1772 = vmatprep.subr.bf16.mxu1 %v2175_v0 }
 0x38b   : > { %463 = vadd.xlane.f32.xlu0 %v462_v14  ;;  %v1204_v16 = vpop.permute.xlu1 %1203 }
 0x38c   : > { %v1209_v20 = vsel %vm474_vm4, %v1204_v16, 0 }
 0x38f   : > { %v1327_v26 = vpop.permute.xlu1 %1326 }
 0x390   : > { %v1332_v28 = vsel %vm474_vm4, %v1327_v26, 0 }
 0x392   : > { %v1944_v15 = vpop.eup %1943 }
 0x393   : > { %v1076_v17 = vsel %vm455_vm5, %v1944_v15, 0.0  ;;  %v1079_v18 = vpack.c.bf16 %v1944_v15, %v1944_v15  ;;  %v1946_v19 = vpop.eup %1945  ;;  %v1929_v15 = vld [vmem:[#allocation10] sm:$0xff]  }
 0x394   : > { %1077 = vadd.xlane.f32.xlu1 %v1076_v17  ;;  %v1322_v21 = vsel %vm455_vm5, %v1946_v19, 0.0  ;;  %v1325_v29 = vpack.c.bf16 %v1946_v19, %v1946_v19  ;;  %1791 = vmatpush3.bf16.msra.mxu0 %v1929_v15  ;;  %v1930_v19 = vld [vmem:[#allocation10 + $0x8] sm:$0xff]  }
 0x395   : > { %1763 = vmatmul.mubr.msk.bf16.vlgmr.msra.gmra.mrb[24].mxu1 %vm455_vm5, %v1079_v18  ;;  %1792 = vmatprep.subr.bf16.mxu0 %v2175_v0 }
 0x396   : > { %1773 = vmatpush3.bf16.msra.mxu1 %v1209_v20  ;;  %1774 = vmatprep.mubr.msk.bf16.mxu1 %vm2176_vm0, %v2175_v0 }
 0x397   : > { %1784 = vmatprep.subr.bf16.mxu1 %v2175_v0 }
 0x398   : > { %1323 = vadd.xlane.f32.xlu1 %v1322_v21  ;;  %1793 = vmatpush3.bf16.msra.mxu0 %v1930_v19 }
 0x39d   : > { %1775 = vmatmul.mubr.msk.bf16.vlgmr.msra.gmra.mrb[28].mxu1 %vm455_vm5, %v1202_v27 }
 0x39e   : > { %1785 = vmatpush3.bf16.msra.mxu1 %v1332_v28  ;;  %1786 = vmatprep.mubr.msk.bf16.mxu1 %vm2176_vm0, %v2175_v0 }
 0x3a5   : > { %1787 = vmatmul.mubr.msk.bf16.vlgmr.msra.gmra.mrb[32].mxu1 %vm455_vm5, %v1325_v29 }
 0x3be   : > { %v512_v30 = vpop.f32.mrb[4].mxu1 }
 0x3bf   : > { %v1704_v31 = vpop.f32.mrb[5].mxu1 }
 0x3c0   : > { %v515_v32 = vpop.f32.mrb[6].mxu1 }
 0x3c1   : > { %v1705_v33 = vpop.f32.mrb[7].mxu1 }
 0x3ec   : > { %v586_v40 = vpop.xlane.xlu1 %585 }
 0x3f4   : > { %v709_v34 = vpop.xlane.xlu0 %708 }
 0x3fc   : > { %v832_v22 = vpop.xlane.xlu1 %831 }
 0x404   : > { %v955_v35 = vpop.xlane.xlu0 %954 }
 0x414   : > { %v1201_v36 = vpop.xlane.xlu0 %1200 }
 0x418   : > { %v464_v37 = vpop.xlane.xlu0 %463 }
 0x419   : > { %1947 = vrcp.f32 %v464_v37 }
 0x41a   : > { %1949 = vrcp.f32 %v586_v40 }
 0x41b   : > { %1951 = vrcp.f32 %v709_v34 }
 0x41c   : > { %1953 = vrcp.f32 %v832_v22 }
 0x41d   : > { %1955 = vrcp.f32 %v955_v35 }
 0x421   : > { %v1078_v62 = vpop.xlane.xlu1 %1077 }
 0x422   : > { %1957 = vrcp.f32 %v1078_v62 }
 0x423   : > { %v1948_v38 = vpop.eup %1947  ;;  %1959 = vrcp.f32 %v1201_v36 }
 0x424   : > { %v519_v39 = vmul.f32 %v1948_v38, %v512_v30  ;;  %v1950_v42 = vpop.eup %1949 }
 0x425   : > { %v1952_v25 = vpop.eup %1951  ;;  %v1324_v10 = vpop.xlane.xlu1 %1323 }
 0x426   : > { %v520_v41 = vpack.c.bf16 %v519_v39, %v519_v39  ;;  %v1954_v53 = vpop.eup %1953  ;;  %1961 = vrcp.f32 %v1324_v10 }
 0x427   : > { %v1956_v60 = vpop.eup %1955 }
 0x428   : > { %522 = vst.msk [vmem:[#allocation3] sm:$0xf] %vm521_vm6, %v520_v41 }
 0x42c   : > { %v1958_v5 = vpop.eup %1957 }
 0x42d   : > { %v1960_v13 = vpop.eup %1959 }
 0x430   : > { %v1962_v26 = vpop.eup %1961 }
 0x433   : > { %v630_v43 = vpop.f32.mrb[8].mxu1 }
 0x434   : > { %v637_v44 = vmul.f32 %v1950_v42, %v630_v43  ;;  %v1716_v23 = vpop.f32.mrb[9].mxu1 }
 0x435   : > { %v633_v45 = vpop.f32.mrb[10].mxu1 }
 0x436   : > { %v1630_v46 = vpack.c.bf16 %v637_v44, %v637_v44  ;;  %v1717_v24 = vpop.f32.mrb[11].mxu1 }
 0x438   : > { %642 = vrot.lane.b32.xlu1 %v1630_v46, %s2192_s11  ;;  %s2081_s11 = sshll.u32 %s2199_s18, 4  ;;  %s2082_s11 = int_to_ptr.vmem [resolvable:$false] %s2081_s11 }
 0x439   : > { %p2084_p5 = scmp.lt.s32.totalorder %s2631_s10, %s2082_s11 }
 0x43b   : > { %v753_v47 = vpop.f32.mrb[12].mxu1 }
 0x43c   : > { %v760_v48 = vmul.f32 %v1952_v25, %v753_v47  ;;  %v1728_v49 = vpop.f32.mrb[13].mxu1 }
 0x43d   : > { %v756_v50 = vpop.f32.mrb[14].mxu1 }
 0x43e   : > { %v1631_v51 = vpack.c.bf16 %v760_v48, %v760_v48  ;;  %v1729_v52 = vpop.f32.mrb[15].mxu1 }
 0x440   : > { %765 = vrot.lane.b32.xlu0 %v1631_v51, %s2193_s23  ;;  %s2083_s23 = scalar_lea.vmem %s2082_s11, 256 }
 0x441   : > { %p2085_p7 = scmp.lt.s32.totalorder %s2083_s23, %s2077_s14 }
 0x443   : > { %v876_v54 = vpop.f32.mrb[16].mxu1  ;;  %p2086_p9 = por %p2085_p7, %p2084_p5 }
 0x444   : > { %v883_v55 = vmul.f32 %v1954_v53, %v876_v54  ;;  %v1740_v56 = vpop.f32.mrb[17].mxu1 }
 0x445   : > { %v879_v57 = vpop.f32.mrb[18].mxu1  ;;  %p2087_p0 = pnand %p2086_p9, %p2080_p3 }
 0x446   : > { %v1632_v58 = vpack.c.bf16 %v883_v55, %v883_v55  ;;  %v1741_v59 = vpop.f32.mrb[19].mxu1 }
 0x448   : > { %888 = vrot.lane.b32.xlu1 %v1632_v58, %s2194_s25 }
 0x45a   : > { %v999_v61 = vpop.f32.mrb[20].mxu1 }
 0x45b   : > { %v1006_v63 = vmul.f32 %v1956_v60, %v999_v61  ;;  %v1752_v1 = vpop.f32.mrb[21].mxu1 }
 0x45c   : > { %v1002_v2 = vpop.f32.mrb[22].mxu1 }
 0x45d   : > { %v1633_v3 = vpack.c.bf16 %v1006_v63, %v1006_v63  ;;  %v1753_v4 = vpop.f32.mrb[23].mxu1 }
 0x45f   : > { %1011 = vrot.lane.b32.xlu1 %v1633_v3, %s2195_s27 }
 0x468   : > { %v1122_v6 = vpop.f32.mrb[24].mxu1 }
 0x469   : > { %v1129_v7 = vmul.f32 %v1958_v5, %v1122_v6  ;;  %v1764_v8 = vpop.f32.mrb[25].mxu1 }
 0x46a   : > { %v1125_v9 = vpop.f32.mrb[26].mxu1 }
 0x46b   : > { %v1634_v11 = vpack.c.bf16 %v1129_v7, %v1129_v7  ;;  %v1765_v12 = vpop.f32.mrb[27].mxu1 }
 0x46d   : > { %1134 = vrot.lane.b32.xlu0 %v1634_v11, %s2196_s24 }
 0x470   : > { %v1245_v14 = vpop.f32.mrb[28].mxu1 }
 0x471   : > { %v1252_v16 = vmul.f32 %v1960_v13, %v1245_v14  ;;  %v1776_v17 = vpop.f32.mrb[29].mxu1 }
 0x472   : > { %v1248_v18 = vpop.f32.mrb[30].mxu1 }
 0x473   : > { %v1635_v20 = vpack.c.bf16 %v1252_v16, %v1252_v16  ;;  %v1777_v21 = vpop.f32.mrb[31].mxu1 }
 0x475   : > { %1257 = vrot.lane.b32.xlu1 %v1635_v20, %s2197_s22 }
 0x478   : > { %v1368_v27 = vpop.f32.mrb[32].mxu1 }
 0x479   : > { %v1375_v28 = vmul.f32 %v1962_v26, %v1368_v27  ;;  %v1788_v29 = vpop.f32.mrb[33].mxu1 }
 0x47a   : > { %v1371_v30 = vpop.f32.mrb[34].mxu1 }
 0x47b   : > { %v1636_v31 = vpack.c.bf16 %v1375_v28, %v1375_v28  ;;  %v1789_v32 = vpop.f32.mrb[35].mxu1 }
 0x47d   : > { %1380 = vrot.lane.b32.xlu0 %v1636_v31, %s2198_s28 }
 0x4aa   : > { %v643_v33 = vpop.permute.xlu1 %642 }
 0x4ab   : > { %646 = vst.msk [vmem:[#allocation3] sm:$0xf] %vm645_vm7, %v643_v33 }
 0x4b2   : > { %v766_v34 = vpop.permute.xlu0 %765 }
 0x4b3   : > { %769 = vst.msk [vmem:[#allocation3] sm:$0xf] %vm768_vm8, %v766_v34 }
 0x4ba   : > { %v889_v0 = vpop.permute.xlu1 %888 }
 0x4bb   : > { %892 = vst.msk [vmem:[#allocation3] sm:$0xf] %vm891_vm9, %v889_v0 }
 0x4d1   : > { %v1012_v35 = vpop.permute.xlu1 %1011 }
 0x4d2   : > { %1015 = vst.msk [vmem:[#allocation3] sm:$0xf] %vm1014_vm10, %v1012_v35 }
 0x4df   : > { %v1135_v36 = vpop.permute.xlu0 %1134 }
 0x4e0   : > { %1138 = vst.msk [vmem:[#allocation3] sm:$0xf] %vm1137_vm11, %v1135_v36 }
 0x4e7   : > { %v1258_v37 = vpop.permute.xlu1 %1257 }
 0x4e8   : > { %1261 = vst.msk [vmem:[#allocation3] sm:$0xf] %vm1260_vm12, %v1258_v37 }
 0x4ef   : > { %v1381_v38 = vpop.permute.xlu0 %1380 }
 0x4f0   : > { %1384 = vst.msk [vmem:[#allocation3] sm:$0xf] %vm1383_vm13, %v1381_v38 }
 0x4f7   : > { %v1385_v39 = vld [vmem:[#allocation3] sm:$0xf] }
 0x4f8   : > { %1795 = vmatmul.mubr.msk.bf16.vlgmr.msra.gmra.mrb[36].mxu0 %vm293_vm1, %v1385_v39 }
 0x5cb   : > { %v1439_v40 = vpop.f32.mrb[36].mxu0 }
 0x5cc   : > { %1445 = vst.msk [vmem:[%s270_s5] sm:$0xff] %vm293_vm1, %v1439_v40  ;;  %v1796_v41 = vpop.f32.mrb[37].mxu0 }
 0x5cd   : > { %v1442_v42 = vpop.f32.mrb[38].mxu0 }
 0x5ce   : > { %2090 = shalt.err (!%p2087_p0)
}
 0x5cf   : > { %s2091_s6 = scalar_lea.hbm %s2629_s21, 128  ;;  %s2095_s24 = scalar_lea.hbm %s2683_s4, 256 }
 0x5d0   : > { %p2092_p4 = scmp.ne.s32.totalorder %s2629_s21, %s2091_s6  ;;  %p2096_p1 = scmp.lt.u32.totalorder %s2629_s21, %s2683_s4 }
 0x5d1   : > { %p2097_p12 = scmp.lt.u32.totalorder %s2095_s24, %s2091_s6  ;;  %p2099_p11 = scmp.lt.u32.totalorder %s2091_s6, %s2629_s21 }
 0x5d2   : > { %p2093_p2 = pnand %p2092_p4, %p2385_p10 }
 0x5d3   : > { %p2098_p13 = por %p2097_p12, %p2096_p1 }
 0x5d4   : > { %p2094_p8 = pneg %p2093_p2 }
 0x5d5   : > { %p2100_p6 = por %p2099_p11, %p2098_p13 }
 0x5d7   : > { %p2101_p3 = pnand %p2100_p6, %p2094_p8 }
 0x5d9   : > { %2104 = shalt.err (!%p2101_p3)
}
 0x5da   : > { %1812 = dma.vmem_to_hbm [thread:$0]  (%p2385_p10), %s2631_s10, 128, %s2629_s21, %s1447_s26   ;;  %v1797_v43 = vpop.f32.mrb[39].mxu0 }
 0x5db PF: > { %s2703_s29 = sld [smem:[#allocation17_spill]]  ;;  %s1473_s8 = sand.u32 1, %s2147_s15  }
 0x5dc   : > { %p2705_p7 = scmp.ge.s32.totalorder %s2167_s20, 2  ;;  %s1474_s5 = scalar_lea.sflag [#allocation6], %s1473_s8 }
 0x5e1   : > { %p2704_p5 = scmp.ne.s32.totalorder %s2703_s29, 0 }
 0x5e3   : > { %p1829_p9 = pnand %p2705_p7, %p2704_p5 }
 0x5e5   : > { %2142 = dma.done.wait (!%p1829_p9), %s1474_s5, 128  }
 0x5e6   : > { %2144 = vsyncadd (!%p1829_p9), %s1474_s5, 4294967168  ;;  %s22_s20 = sadd.s32 1, %s2167_s20   ;;  %s2706_s15 = smov %s2151_s16 }
 0x5e7   : > { %p19_p0 = scmp.ge.s32.totalorder %s22_s20, 4   ;;  %s2707_s16 = smov %s2155_s17 }
 0x5e8   : > { %s2708_s17 = smov %s2397_s7  ;;  %s2709_s18 = smov %s2163_s19 }
 0x5e9   : > { %s2710_s19 = smov %s2712_s30  ;;  %21 = sbr.rel (!%p19_p0) target bundleno = 8 (0x8), region = 98 }
 0x5f0   :  { %1479 = vsyncpa [#allocation5], 1 }
 0x5f1   :  { %1481 = vsyncpa [#allocation5 + $0x1], 1 }
 0x5f2   :  { %1482 = vsyncpa [#allocation8], 1 }
 0x5f3   :  { %1483 = vsyncpa [#allocation11], 1 }
 0x5f4   :  { %1484 = vsyncpa [#allocation6], 1 }
 0x5f5   :  { %1486 = vsyncpa [#allocation6 + $0x1], 1 }

// kernel: tpu_custom_call.1
= control target key start
LH: loop header
LB: loop body
LE: loop exit
PB: predicated region body
PF: predicated region fallthrough
CT: control target
= control target key end

     0   :  { %9 = vsyncpa [#allocation5], 0  ;;  %s2679_s0 = inlined_call_operand.hbm [shape: bf16[2,8,32], index: 0, kind: input, shape index: {}]   ;;  %s2680_s1 = inlined_call_operand.hbm [shape: bf16[32,32], index: 1, kind: input, shape index: {}]   ;;  %s2681_s2 = inlined_call_operand.hbm [shape: bf16[32,64], index: 2, kind: input, shape index: {}]   ;;  %s2682_s3 = inlined_call_operand.hbm [shape: bf16[32,32], index: 3, kind: input, shape index: {}]   ;;  %s2683_s4 = inlined_call_operand.hbm [shape: f32[2,8,32], index: 4, kind: output, shape index: {}]  }
   0x1   :  { %11 = vsyncpa [#allocation5 + $0x1], 0 }
   0x2   :  { %12 = vsyncpa [#allocation8], 0 }
   0x3   :  { %13 = vsyncpa [#allocation11], 0 }
   0x4   :  { %14 = vsyncpa [#allocation6], 0 }
   0x5   :  { %16 = vsyncpa [#allocation6 + $0x1], 0  ;;  %s2225_s15 = smov 0   ;;  %s2227_s16 = smov 0  }
   0x6   :  { %s2229_s17 = smov 0   ;;  %s2231_s18 = smov 0  }
   0x7   :  { %s2233_s19 = smov 0   ;;  %s2235_s20 = smov 0  }
   0x8 LB: > { %s1571_s21 = sadd.s32 4294967295, %s2167_s20   ;;  %s1572_s22 = sadd.s32 4294967294, %s2167_s20   ;;  %s2167_s20 = sphi %s2235_s20, %s22_s20   ;;  %s2163_s19 = sphi %s2233_s19, %s2710_s19   ;;  %s2159_s18 = sphi %s2231_s18, %s2709_s18   ;;  %s2155_s17 = sphi %s2229_s17, %s2708_s17   ;;  %s2151_s16 = sphi %s2227_s16, %s2707_s16   ;;  %s2147_s15 = sphi %s2225_s15, %s2706_s15  }
   0x9   : > { %p54_p0 = scmp.ne.s32.totalorder %s2151_s16, %s2147_s15  ;;  %p2259_p1 = scmp.eq.s32.totalorder %s1571_s21, 0 }
   0xa   : > { %p2263_p2 = scmp.eq.s32.totalorder %s1571_s21, 1  ;;  %p149_p3 = scmp.eq.s32.totalorder %s1572_s22, 1 }
   0xb   : > { %s2689_s23 = scalar_select %p2259_p1, 1, 0 }
   0xc   : > { %s2690_s24 = scalar_select %p2263_p2, 1, 0 }
   0xd   : > { %p2269_p4 = por %p2259_p1, %p54_p0  ;;  %p1573_p5 = scmp.ge.s32.totalorder %s2167_s20, 1 }
   0xe   : > { %p2274_p6 = por %p149_p3, %p54_p0  ;;  %p156_p7 = scmp.lt.s32.totalorder %s2167_s20, 3 }
   0xf   : > { %s2691_s25 = scalar_select %p2269_p4, 1, 0 }
  0x10   : > { %s2692_s26 = scalar_select %p2274_p6, 1, 0 }
  0x11   : > { %p2279_p8 = pnand %p1573_p5, %p156_p7  ;;  %s2169_s28 = smov [#allocation7]  }
  0x12   : > { %2693 = sst [smem:[#allocation17_spill]] %s2692_s26  ;;  %s168_s29 = sshll.u32 %s2169_s28, 4  ;;  %s2283_s29 = int_to_ptr.vmem [resolvable:$true] %s168_s29 }
  0x13   : > { %s2694_s27 = scalar_select %p2279_p8, 1, 0 }
  0x14   : > { %p1814_p9 = pneg %p2279_p8  ;;  %s2170_s5 = smov [#allocation9]  }
  0x15   : > { %s181_s6 = sshll.u32 %s2170_s5, 4  ;;  %s2171_s7 = smov [#allocation10]   ;;  %s2294_s6 = int_to_ptr.vmem [resolvable:$true] %s181_s6 }
  0x16   : > { %p2290_p11 = pnand %p1814_p9, %p2259_p1  ;;  %s2296_s8 = sshll.u32 %s2171_s7, 4  ;;  %s195_s8 = int_to_ptr.vmem [resolvable:$true] %s2296_s8 }
  0x17   : > { %s1963_s11 = scalar_lea.hbm %s2680_s1, 256 }
  0x18   : > { %p1964_p12 = scmp.ne.s32.totalorder %s2680_s1, %s1963_s11  ;;  %p2306_p13 = pneg %p2290_p11 }
  0x19   : > { %p1970_p5 = scmp.lt.u32.totalorder %s1963_s11, %s2680_s1 }
  0x1a   : > { %p1966_p0 = pnand %p2306_p13, %p1964_p12 }
  0x1c   : > { %p1967_p3 = pneg %p1966_p0 }
  0x1e   : > { %p1972_p7 = pnand %p1970_p5, %p1967_p3 }
  0x20   : > { %1975 = shalt.err (!%p1972_p7)
}
  0x21   : > { %s1976_s28 = scalar_lea.vmem %s2283_s29, 256  ;;  %p1984_p1 = scmp.lt.s32.totalorder %s2283_s29, %s2283_s29 }
  0x22   : > { %p1977_p9 = scmp.ne.s32.totalorder %s2283_s29, %s1976_s28  ;;  %p1985_p4 = scmp.lt.s32.totalorder %s1976_s28, %s1976_s28 }
  0x24   : > { %p1979_p10 = pnand %p1977_p9, %p2306_p13  ;;  %p1986_p12 = por %p1985_p4, %p1984_p1 }
  0x26   : > { %p1980_p6 = pneg %p1979_p10 }
  0x28   : > { %p1987_p0 = pnand %p1986_p12, %p1980_p6 }
  0x2a   : > { %1990 = shalt.err (!%p1987_p0)
}
  0x2b   : > { %s2172_s5 = smov 64   ;;  %s2173_s7 = smov 4  }
  0x2c   : > { %1817 = dma.hbm_to_vmem [thread:$0]  (!%p2290_p11), %s2680_s1, 256, %s2283_s29, [#allocation8], %s2172_s5, %s2172_s5, %s2173_s7  }
  0x2d   : > { %s1991_s13 = scalar_lea.hbm %s2681_s2, 256 }
  0x2e   : > { %p1992_p1 = scmp.ne.s32.totalorder %s2681_s2, %s1991_s13  ;;  %p1998_p10 = scmp.lt.u32.totalorder %s1991_s13, %s2681_s2 }
  0x30   : > { %p1994_p4 = pnand %p1992_p1, %p2306_p13 }
  0x32   : > { %p1995_p6 = pneg %p1994_p4 }
  0x34   : > { %p2000_p3 = pnand %p1998_p10, %p1995_p6 }
  0x36   : > { %2003 = shalt.err (!%p2000_p3)
}
  0x37   : > { %s2004_s29 = scalar_lea.vmem %s2294_s6, 256  ;;  %p2012_p12 = scmp.lt.s32.totalorder %s2294_s6, %s2294_s6 }
  0x38   : > { %p2005_p5 = scmp.ne.s32.totalorder %s2294_s6, %s2004_s29  ;;  %p2013_p0 = scmp.lt.s32.totalorder %s2004_s29, %s2004_s29 }
  0x3a   : > { %p2007_p7 = pnand %p2005_p5, %p2306_p13  ;;  %p2014_p1 = por %p2013_p0, %p2012_p12 }
  0x3c   : > { %p2008_p9 = pneg %p2007_p7 }
  0x3e   : > { %p2015_p4 = pnand %p2014_p1, %p2008_p9 }
  0x40   : > { %2018 = shalt.err (!%p2015_p4)
}
  0x41   : > { %1820 = dma.hbm_to_vmem [thread:$0]  (!%p2290_p11), %s2681_s2, 256, %s2294_s6, [#allocation8], %s2172_s5, %s2172_s5, %s2173_s7  }
  0x42   : > { %s2019_s12 = scalar_lea.hbm %s2682_s3, 256 }
  0x43   : > { %p2020_p6 = scmp.ne.s32.totalorder %s2682_s3, %s2019_s12  ;;  %p2026_p5 = scmp.lt.u32.totalorder %s2019_s12, %s2682_s3 }
  0x45   : > { %p2022_p10 = pnand %p2020_p6, %p2306_p13 }
  0x47   : > { %p2023_p3 = pneg %p2022_p10 }
  0x49   : > { %p2028_p7 = pnand %p2026_p5, %p2023_p3 }
  0x4b   : > { %2031 = shalt.err (!%p2028_p7)
}
  0x4c   : > { %s2032_s29 = scalar_lea.vmem %s195_s8, 256  ;;  %p2040_p1 = scmp.lt.s32.totalorder %s195_s8, %s195_s8 }
  0x4d   : > { %p2033_p9 = scmp.ne.s32.totalorder %s195_s8, %s2032_s29  ;;  %p2041_p4 = scmp.lt.s32.totalorder %s2032_s29, %s2032_s29 }
  0x4f   : > { %p2035_p12 = pnand %p2033_p9, %p2306_p13  ;;  %p2042_p8 = por %p2041_p4, %p2040_p1 }
  0x51   : > { %p2036_p0 = pneg %p2035_p12 }
  0x53   : > { %p2043_p2 = pnand %p2042_p8, %p2036_p0 }
  0x55   : > { %2046 = shalt.err (!%p2043_p2)
}
  0x56   : > { %1823 = dma.hbm_to_vmem [thread:$0]  (!%p2290_p11), %s2682_s3, 256, %s195_s8, [#allocation11], %s2172_s5, %s2172_s5, %s2173_s7  }
  0x57   : > { %s41_s14 = sadd.s32 1, %s2155_s17  ;;  %s34_s30 = sadd.s32 1, %s2163_s19 }
  0x58   : > { %p48_p2 = scmp.ne.s32.totalorder %s2155_s17, %s2151_s16  ;;  %p36_p8 = scmp.ge.s32.totalorder %s34_s30, 2 }
  0x59   : > { %p49_p13 = scmp.eq.s32.totalorder %s2167_s20, 0  ;;  %p2697_p6 = scmp.ne.s32.totalorder %s2690_s24, 0 }
  0x5a   : > { %p1835_p3 = scmp.lt.s32.totalorder %s2167_s20, 2  ;;  %s2712_s30 = smov (%p36_p8, %s34_s30), 0 }
  0x5b   : > { %p2385_p10 = por %p2697_p6, %p48_p2  ;;  %p50_p5 = por %p49_p13, %p48_p2 }
  0x5c   : > { %s208_s10 = sand.u32 1, %s2155_s17   ;;  %s38_s11 = ssub.s32 %s2163_s19, %s2712_s30 }
  0x5d   : > { %p39_p7 = scmp.eq.s32.totalorder %s38_s11, 0  ;;  %s1578_s8 = sshll.u32 %s208_s10, 2 }
  0x5e   : > { %s1579_s5 = sshll.u32 %s2163_s19, 6  ;;  %s212_s21 = scalar_lea.vmem [#allocation4], %s1578_s8 }
  0x5f   : > { %s2397_s7 = scalar_select %p39_p7, %s2155_s17, %s41_s14  }
  0x60   : > { %s2402_s24 = scalar_lea.hbm %s2679_s0, %s1579_s5  ;;  %s219_s22 = sshll.u32 %s212_s21, 4  ;;  %s2404_s22 = int_to_ptr.vmem [resolvable:$true] %s219_s22 }
  0x61   : > { %p2408_p11 = pnand %p1835_p3, %p50_p5  ;;  %s209_s29 = scalar_lea.sflag [#allocation5], %s208_s10 }
  0x62   : > { %s2047_s6 = scalar_lea.hbm %s2402_s24, 64  ;;  %s2052_s11 = scalar_lea.hbm %s2679_s0, 128 }
  0x63   : > { %p2048_p9 = scmp.ne.s32.totalorder %s2402_s24, %s2047_s6  ;;  %p2049_p12 = pneg %p2408_p11 }
  0x64   : > { %p2053_p4 = scmp.lt.u32.totalorder %s2402_s24, %s2679_s0  ;;  %p2054_p2 = scmp.lt.u32.totalorder %s2052_s11, %s2047_s6 }
  0x65   : > { %p2050_p0 = pnand %p2049_p12, %p2048_p9  ;;  %p2056_p13 = scmp.lt.u32.totalorder %s2047_s6, %s2402_s24 }
  0x66   : > { %p2055_p8 = por %p2054_p2, %p2053_p4 }
  0x67   : > { %p2051_p1 = pneg %p2050_p0 }
  0x68   : > { %p2057_p6 = por %p2056_p13, %p2055_p8 }
  0x6a   : > { %p2058_p3 = pnand %p2057_p6, %p2051_p1 }
  0x6c   : > { %2061 = shalt.err (!%p2058_p3)
}
  0x6d   : > { %s2062_s10 = scalar_lea.vmem %s2404_s22, 64  ;;  %s2174_s12 = smov [#allocation4]  }
  0x6e   : > { %p2063_p5 = scmp.ne.s32.totalorder %s2404_s22, %s2062_s10  ;;  %s2067_s13 = sshll.u32 %s2174_s12, 4  ;;  %s2068_s13 = int_to_ptr.vmem [resolvable:$false] %s2067_s13 }
  0x6f   : > { %s2069_s21 = scalar_lea.vmem %s2068_s13, 128  ;;  %p2070_p0 = scmp.lt.s32.totalorder %s2404_s22, %s2068_s13 }
  0x70   : > { %p2065_p7 = pnand %p2063_p5, %p2049_p12  ;;  %p2071_p4 = scmp.lt.s32.totalorder %s2069_s21, %s2062_s10 }
  0x72   : > { %p2066_p9 = pneg %p2065_p7  ;;  %p2072_p2 = por %p2071_p4, %p2070_p0 }
  0x74   : > { %p2073_p8 = pnand %p2072_p2, %p2066_p9 }
  0x76   : > { %2076 = shalt.err (!%p2073_p8)
}
  0x77   : > { %1827 = dma.hbm_to_vmem [thread:$0]  (!%p2408_p11), %s2402_s24, 64, %s2404_s22, %s209_s29  }
  0x78   : > { %p2700_p1 = scmp.ne.s32.totalorder %s2694_s27, 0 }
  0x79   : > { %s2440_s6 = sand.u32 (!%p2700_p1), 1, %s2151_s16   ;;  %p2701_p12 = scmp.ne.s32.totalorder (!%p2700_p1), %s2691_s25, 0 }
  0x7a   : > { %228 = sbr.rel (%p2700_p1) target bundleno = 1499 (0x5db), region = 36  ;;  %s1581_s26 = sshll.u32 (!%p2700_p1), %s2440_s6, 2 }
  0x7b   : > { %s231_s14 = scalar_lea.sflag (!%p2700_p1), [#allocation5], %s2440_s6  ;;  %s234_s11 = scalar_lea.vmem (!%p2700_p1), [#allocation4], %s1581_s26 }
  0x81   : > { %2130 = dma.done.wait (%p2701_p12), %s231_s14, 64  }
  0x82   : > { %2132 = vsyncadd (%p2701_p12), %s231_s14, 4294967232  ;;  %p2702_p13 = scmp.ne.s32.totalorder %s2689_s23, 0 }
  0x84   : > { %2134 = dma.done.wait (%p2702_p13), [#allocation8], 512  }
  0x85   : > { %2136 = vsyncadd (%p2702_p13), [#allocation8], 4294966784 }
  0x86   : > { %2138 = dma.done.wait (%p2702_p13), [#allocation11], 256  }
  0x87   : > { %2140 = vsyncadd (%p2702_p13), [#allocation11], 4294967040  ;;  %v2175_v0 = vmov 0.0   ;;  %vm2176_vm0 = vmmov 0   ;;  %v1917_v1 = vld [vmem:[#allocation9] sm:$0xff]   ;;  %v1918_v2 = vld [vmem:[#allocation9 + $0x8] sm:$0xff]  }
  0x88   : > { %1678 = vmatprep.subr.bf16.mxu0 %v2175_v0  ;;  %1682 = vmatprep.mubr.msk.bf16.mxu0 %vm2176_vm0, %v2175_v0  ;;  %v1919_v3 = vld [vmem:[#allocation7] sm:$0xff]   ;;  %v1920_v4 = vld [vmem:[#allocation7 + $0x8] sm:$0xff]   ;;  %v276_v5 = vld [vmem:[%s234_s11] sm:$0xf]  ;;  %vm293_vm1 = vcmask 261120   ;;  %vm338_vm2 = vcmask 519168  }
  0x89   : > { %1686 = vmatprep.subr.bf16.mxu1 %v2175_v0  ;;  %1690 = vmatprep.mubr.msk.bf16.mxu1 %vm2176_vm0, %v2175_v0  ;;  %v345_v6 = vld [vmem:[%s234_s11] sm:$0xf]  ;;  %vm408_vm3 = vcmask 31744   ;;  %s2177_s23 = smov 120   ;;  %s2178_s25 = smov 124   ;;  %vm474_vm4 = vcmask 1043456  }
  0x8a   : > { %1679 = vmatpush3.bf16.msra.mxu0 %v1917_v1  ;;  %1687 = vmatpush3.bf16.msra.mxu1 %v1919_v3  ;;  %s2179_s27 = smov 116   ;;  %s2180_s24 = smov 112   ;;  %vm455_vm5 = vcmask 64512   ;;  %vm521_vm6 = vcmask 27648   ;;  %vm645_vm7 = vcmask 60448   ;;  %vm768_vm8 = vcmask 93248  }
  0x8b   : > { %1680 = vmatprep.subr.bf16.mxu0 %v2175_v0  ;;  %1688 = vmatprep.subr.bf16.mxu1 %v2175_v0  ;;  %s2181_s22 = smov 108   ;;  %s2182_s28 = smov 104   ;;  %vm891_vm9 = vcmask 126048   ;;  %vm1014_vm10 = vcmask 158848   ;;  %vm1137_vm11 = vcmask 191648   ;;  %vm1260_vm12 = vcmask 224448  }
  0x8c   : > { %s2183_s29 = smov 100   ;;  %s2184_s8 = smov 96   ;;  %vm1383_vm13 = vcmask 257248  }
  0x8d   : > { %s2185_s5 = smov 92   ;;  %s2186_s10 = smov 88  }
  0x8e   : > { %1681 = vmatpush3.bf16.msra.mxu0 %v1918_v2  ;;  %1689 = vmatpush3.bf16.msra.mxu1 %v1920_v4  ;;  %s2187_s12 = smov 84   ;;  %s2188_s13 = smov 76  }
  0x8f   : > { %1694 = vmatprep.subr.bf16.mxu0 %v2175_v0  ;;  %1700 = vmatprep.subr.bf16.mxu1 %v2175_v0  ;;  %s2189_s21 = smov 80   ;;  %s2190_s26 = smov 72  }
  0x90   : > { %s2191_s14 = smov 68   ;;  %s2192_s11 = smov 4  }
  0x91   : > { %1683 = vmatmul.mubr.msk.bf16.vlgmr.msra.gmra.mrb[0].mxu0 %vm293_vm1, %v276_v5  ;;  %1691 = vmatmul.mubr.msk.bf16.vlgmr.msra.gmra.mrb[0].mxu1 %vm293_vm1, %v345_v6 }
  0x92   : > { %1696 = vmatprep.mubr.msk.bf16.mxu0 %vm2176_vm0, %v2175_v0  ;;  %1702 = vmatprep.mubr.msk.bf16.mxu1 %vm2176_vm0, %v2175_v0 }
 0x164   : > { %v331_v7 = vpop.f32.mrb[0].mxu0  ;;  %v400_v12 = vpop.f32.mrb[0].mxu1 }
 0x165   : > { %v337_v8 = vpack.c.bf16 %v331_v7, %v331_v7  ;;  %v1684_v9 = vpop.f32.mrb[1].mxu0  ;;  %v1692_v13 = vpop.f32.mrb[1].mxu1  ;;  %v406_v20 = vpack.c.bf16 %v400_v12, %v400_v12 }
 0x166   : > { %v334_v10 = vpop.f32.mrb[2].mxu0  ;;  %v403_v14 = vpop.f32.mrb[2].mxu1 }
 0x167   : > { %339 = vst.msk [vmem:[#allocation2] sm:$0xf] %vm338_vm2, %v337_v8  ;;  %v1685_v11 = vpop.f32.mrb[3].mxu0  ;;  %v1693_v15 = vpop.f32.mrb[3].mxu1 }
 0x16e   : > { %v407_v16 = vld [vmem:[#allocation2] sm:$0xf] }
 0x16f   : > { %v2472_v17 = vld [vmem:[#allocation2] ss:$0 sps:$4 sm:$0xff]   ;;  %v413_v18 = vsel %vm408_vm3, %v407_v16, 0  ;;  %v1593_v26 = vcombine.low %v407_v16, %v407_v16 }
 0x170   : > { %v1922_v19 = vld [vmem:[#allocation2] ss:$0 sps:$4 sm:$0xff]   ;;  %1695 = vmatpush3.bf16.xpose.msra.mxu0 %v413_v18  ;;  %653 = vrot.lane.b32.xlu1 %v2472_v17, %s2177_s23 }
 0x171   : > { %530 = vrot.lane.b32.xlu0 %v1922_v19, %s2178_s25  ;;  %1706 = vmatprep.subr.bf16.mxu0 %v2175_v0  ;;  %v2478_v21 = vld [vmem:[#allocation2] ss:$0 sps:$4 sm:$0xff]  }
 0x172   : > { %v2483_v22 = vld [vmem:[#allocation2] ss:$0 sps:$4 sm:$0xff]  }
 0x173   : > { %v2486_v23 = vld [vmem:[#allocation2] ss:$0 sps:$4 sm:$0xff]  }
 0x174   : > { %648 = vrot.lane.b32.xlu1 %v406_v20, %s2177_s23  ;;  %v2489_v24 = vld [vmem:[#allocation2] ss:$0 sps:$4 sm:$0xff]   ;;  %s2193_s23 = smov 8  }
 0x175   : > { %525 = vrot.lane.b32.xlu0 %v406_v20, %s2178_s25  ;;  %v2492_v25 = vld [vmem:[#allocation2] ss:$0 sps:$4 sm:$0xff]   ;;  %s2194_s25 = smov 12  }
 0x177   : > { %1697 = vmatmul.mubr.msk.bf16.vlgmr.msra.gmra.mrb[4].mxu0 %vm408_vm3, %v406_v20 }
 0x178   : > { %771 = vrot.lane.b32.xlu1 %v406_v20, %s2179_s27  ;;  %1708 = vmatprep.mubr.msk.bf16.mxu0 %vm2176_vm0, %v2175_v0 }
 0x179   : > { %776 = vrot.lane.b32.xlu0 %v2478_v21, %s2179_s27  ;;  %s2195_s27 = smov 16  }
 0x17c   : > { %894 = vrot.lane.b32.xlu1 %v406_v20, %s2180_s24 }
 0x17d   : > { %899 = vrot.lane.b32.xlu0 %v2483_v22, %s2180_s24  ;;  %s2196_s24 = smov 20  }
 0x180   : > { %1017 = vrot.lane.b32.xlu1 %v406_v20, %s2181_s22 }
 0x181   : > { %1022 = vrot.lane.b32.xlu0 %v2486_v23, %s2181_s22  ;;  %s2197_s22 = smov 24  }
 0x184   : > { %1140 = vrot.lane.b32.xlu1 %v406_v20, %s2182_s28 }
 0x185   : > { %1145 = vrot.lane.b32.xlu0 %v2489_v24, %s2182_s28  ;;  %s2198_s28 = smov 28  }
 0x188   : > { %1263 = vrot.lane.b32.xlu1 %v406_v20, %s2183_s29 }
 0x189   : > { %1268 = vrot.lane.b32.xlu0 %v2492_v25, %s2183_s29  ;;  %s1585_s29 = sshll.u32 %s2440_s6, 3 }
 0x18c   : > { %469 = vrot.lane.b32.xlu1 %v1593_v26, %s2184_s8  ;;  %s1627_s8 = sshll.u32 %s2159_s18, 7  ;;  %s2199_s18 = smov [#allocation12]  }
 0x18d   : > { %588 = vrot.lane.b32.xlu0 %v1922_v19, %s2185_s5  ;;  %s270_s5 = scalar_lea.vmem [#allocation12], %s1585_s29 }
 0x1e2   : > { %v654_v27 = vpop.permute.xlu1 %653 }
 0x1e3   : > { %v531_v28 = vpop.permute.xlu0 %530  ;;  %v659_v33 = vsel %vm408_vm3, %v654_v27, 0 }
 0x1e4   : > { %v536_v29 = vsel %vm408_vm3, %v531_v28, 0 }
 0x1e5   : > { %1707 = vmatpush3.bf16.xpose.msra.mxu0 %v536_v29 }
 0x1e6   : > { %v649_v30 = vpop.permute.xlu1 %648  ;;  %1718 = vmatprep.subr.bf16.mxu0 %v2175_v0 }
 0x1e7   : > { %v526_v32 = vpop.permute.xlu0 %525 }
 0x1ea   : > { %v772_v31 = vpop.permute.xlu1 %771 }
 0x1eb   : > { %v777_v35 = vpop.permute.xlu0 %776 }
 0x1ec   : > { %1709 = vmatmul.mubr.msk.bf16.vlgmr.msra.gmra.mrb[8].mxu0 %vm408_vm3, %v526_v32  ;;  %v782_v37 = vsel %vm408_vm3, %v777_v35, 0 }
 0x1ed   : > { %1719 = vmatpush3.bf16.xpose.msra.mxu0 %v659_v33  ;;  %1720 = vmatprep.mubr.msk.bf16.mxu0 %vm2176_vm0, %v2175_v0 }
 0x1ee   : > { %v895_v34 = vpop.permute.xlu1 %894  ;;  %1730 = vmatprep.subr.bf16.mxu0 %v2175_v0 }
 0x1ef   : > { %v900_v39 = vpop.permute.xlu0 %899 }
 0x1f0   : > { %v905_v41 = vsel %vm408_vm3, %v900_v39, 0 }
 0x1f2   : > { %v1018_v36 = vpop.permute.xlu1 %1017 }
 0x1f3   : > { %v1023_v44 = vpop.permute.xlu0 %1022 }
 0x1f4   : > { %1721 = vmatmul.mubr.msk.bf16.vlgmr.msra.gmra.mrb[12].mxu0 %vm408_vm3, %v649_v30  ;;  %v1028_v45 = vsel %vm408_vm3, %v1023_v44, 0 }
 0x1f5   : > { %1731 = vmatpush3.bf16.xpose.msra.mxu0 %v782_v37  ;;  %1732 = vmatprep.mubr.msk.bf16.mxu0 %vm2176_vm0, %v2175_v0 }
 0x1f6   : > { %v1141_v38 = vpop.permute.xlu1 %1140  ;;  %1742 = vmatprep.subr.bf16.mxu0 %v2175_v0 }
 0x1f7   : > { %v1146_v46 = vpop.permute.xlu0 %1145 }
 0x1f8   : > { %v1151_v47 = vsel %vm408_vm3, %v1146_v46, 0 }
 0x1fa   : > { %v1264_v40 = vpop.permute.xlu1 %1263 }
 0x1fb   : > { %v1269_v48 = vpop.permute.xlu0 %1268 }
 0x1fc   : > { %1733 = vmatmul.mubr.msk.bf16.vlgmr.msra.gmra.mrb[16].mxu0 %vm408_vm3, %v772_v31  ;;  %v1274_v49 = vsel %vm408_vm3, %v1269_v48, 0 }
 0x1fd   : > { %1743 = vmatpush3.bf16.xpose.msra.mxu0 %v905_v41  ;;  %1744 = vmatprep.mubr.msk.bf16.mxu0 %vm2176_vm0, %v2175_v0 }
 0x1fe   : > { %v470_v42 = vpop.permute.xlu1 %469  ;;  %1754 = vmatprep.subr.bf16.mxu0 %v2175_v0 }
 0x1ff   : > { %v476_v43 = vsel %vm474_vm4, %v470_v42, 0  ;;  %v589_v7 = vpop.permute.xlu0 %588 }
 0x200   : > { %1701 = vmatpush3.bf16.msra.mxu1 %v476_v43  ;;  %v594_v31 = vsel %vm474_vm4, %v589_v7, 0 }
 0x201   : > { %1712 = vmatprep.subr.bf16.mxu1 %v2175_v0 }
 0x204   : > { %1745 = vmatmul.mubr.msk.bf16.vlgmr.msra.gmra.mrb[20].mxu0 %vm408_vm3, %v895_v34 }
 0x205   : > { %1755 = vmatpush3.bf16.xpose.msra.mxu0 %v1028_v45  ;;  %1756 = vmatprep.mubr.msk.bf16.mxu0 %vm2176_vm0, %v2175_v0 }
 0x206   : > { %1766 = vmatprep.subr.bf16.mxu0 %v2175_v0 }
 0x20c   : > { %1757 = vmatmul.mubr.msk.bf16.vlgmr.msra.gmra.mrb[24].mxu0 %vm408_vm3, %v1018_v36 }
 0x20d   : > { %1767 = vmatpush3.bf16.xpose.msra.mxu0 %v1151_v47  ;;  %1768 = vmatprep.mubr.msk.bf16.mxu0 %vm2176_vm0, %v2175_v0 }
 0x20e   : > { %1778 = vmatprep.subr.bf16.mxu0 %v2175_v0 }
 0x214   : > { %1769 = vmatmul.mubr.msk.bf16.vlgmr.msra.gmra.mrb[28].mxu0 %vm408_vm3, %v1141_v38 }
 0x215   : > { %1779 = vmatpush3.bf16.xpose.msra.mxu0 %v1274_v49  ;;  %1780 = vmatprep.mubr.msk.bf16.mxu0 %vm2176_vm0, %v2175_v0 }
 0x216   : > { %1790 = vmatprep.subr.bf16.mxu0 %v2175_v0 }
 0x21c   : > { %1781 = vmatmul.mubr.msk.bf16.vlgmr.msra.gmra.mrb[32].mxu0 %vm408_vm3, %v1264_v40 }
 0x21d   : > { %1794 = vmatprep.mubr.msk.bf16.mxu0 %vm2176_vm0, %v2175_v0 }
 0x24a   : > { %v449_v50 = vpop.f32.mrb[4].mxu0 }
 0x24b   : > { %v1698_v51 = vpop.f32.mrb[5].mxu0  ;;  %v456_v52 = vsel %vm455_vm5, %v449_v50, -inf }
 0x24c   : > { %457 = vmax.xlane.f32.xlu0 %v456_v52  ;;  %v452_v53 = vpop.f32.mrb[6].mxu0 }
 0x24d   : > { %v1699_v54 = vpop.f32.mrb[7].mxu0 }
 0x262   : > { %711 = vrot.lane.b32.xlu0 %v2472_v17, %s2186_s10  ;;  %s1461_s10 = sshll.u32 %s270_s5, 4  ;;  %s2631_s10 = int_to_ptr.vmem [resolvable:$true] %s1461_s10 }
 0x2bf   : > { %v2534_v55 = vpop.f32.mrb[8].mxu0 }
 0x2c0   : > { %v1710_v56 = vpop.f32.mrb[9].mxu0  ;;  %v578_v57 = vsel %vm455_vm5, %v2534_v55, -inf }
 0x2c1   : > { %579 = vmax.xlane.f32.xlu1 %v578_v57  ;;  %v575_v58 = vpop.f32.mrb[10].mxu0 }
 0x2c2   : > { %v1711_v59 = vpop.f32.mrb[11].mxu0 }
 0x2c7   : > { %v2538_v60 = vpop.f32.mrb[12].mxu0 }
 0x2c8   : > { %v1722_v61 = vpop.f32.mrb[13].mxu0  ;;  %v701_v62 = vsel %vm455_vm5, %v2538_v60, -inf }
 0x2c9   : > { %702 = vmax.xlane.f32.xlu0 %v701_v62  ;;  %v698_v63 = vpop.f32.mrb[14].mxu0 }
 0x2ca   : > { %v1723_v1 = vpop.f32.mrb[15].mxu0 }
 0x2cf   : > { %v2542_v2 = vpop.f32.mrb[16].mxu0 }
 0x2d0   : > { %v1734_v3 = vpop.f32.mrb[17].mxu0  ;;  %v824_v4 = vsel %vm455_vm5, %v2542_v2, -inf }
 0x2d1   : > { %825 = vmax.xlane.f32.xlu0 %v824_v4  ;;  %v821_v5 = vpop.f32.mrb[18].mxu0 }
 0x2d2   : > { %834 = vrot.lane.b32.xlu1 %v2478_v21, %s2187_s12  ;;  %v1735_v6 = vpop.f32.mrb[19].mxu0 }
 0x2d7   : > { %v2547_v8 = vpop.f32.mrb[20].mxu0 }
 0x2d8   : > { %v1746_v9 = vpop.f32.mrb[21].mxu0  ;;  %v947_v10 = vsel %vm455_vm5, %v2547_v8, -inf }
 0x2d9   : > { %v458_v11 = vpop.xlane.xlu0 %457  ;;  %948 = vmax.xlane.f32.xlu0 %v947_v10  ;;  %v944_v12 = vpop.f32.mrb[22].mxu0 }
 0x2da   : > { %v459_v13 = vsub.f32 %v449_v50, %v458_v11  ;;  %v1747_v14 = vpop.f32.mrb[23].mxu0 }
 0x2dc   : > { %v460_v15 = vmul.f32 1.442695, %v459_v13 }
 0x2dd   : > { %v712_v41 = vpop.permute.xlu0 %711 }
 0x2de   : > { %1931 = vpow2.f32 %v460_v15 }
 0x2df   : > { %v2551_v16 = vpop.f32.mrb[24].mxu0 }
 0x2e0   : > { %v1758_v17 = vpop.f32.mrb[25].mxu0  ;;  %v1070_v37 = vsel %vm455_vm5, %v2551_v16, -inf }
 0x2e1   : > { %v1067_v18 = vpop.f32.mrb[26].mxu0 }
 0x2e2   : > { %v1759_v19 = vpop.f32.mrb[27].mxu0 }
 0x2e7   : > { %v2553_v20 = vpop.f32.mrb[28].mxu0 }
 0x2e8   : > { %v2555_v21 = vpop.eup %1931  ;;  %v1770_v26 = vpop.f32.mrb[29].mxu0  ;;  %v1193_v27 = vsel %vm455_vm5, %v2553_v20, -inf }
 0x2e9   : > { %1194 = vmax.xlane.f32.xlu0 %v1193_v27  ;;  %v1190_v28 = vpop.f32.mrb[30].mxu0  ;;  %v465_v29 = vpack.c.bf16 %v2555_v21, %v2555_v21  ;;  %v462_v14 = vsel %vm455_vm5, %v2555_v21, 0.0 }
 0x2ea   : > { %v1771_v30 = vpop.f32.mrb[31].mxu0 }
 0x2eb   : > { %1703 = vmatmul.mubr.msk.bf16.vlgmr.msra.gmra.mrb[4].mxu1 %vm455_vm5, %v465_v29 }
 0x2ec   : > { %1713 = vmatpush3.bf16.msra.mxu1 %v594_v31  ;;  %1714 = vmatprep.mubr.msk.bf16.mxu1 %vm2176_vm0, %v2175_v0 }
 0x2ed   : > { %1724 = vmatprep.subr.bf16.mxu1 %v2175_v0 }
 0x2ef   : > { %v2566_v32 = vpop.f32.mrb[32].mxu0 }
 0x2f0   : > { %v1782_v33 = vpop.f32.mrb[33].mxu0  ;;  %v1316_v34 = vsel %vm455_vm5, %v2566_v32, -inf }
 0x2f1   : > { %1317 = vmax.xlane.f32.xlu0 %v1316_v34  ;;  %v1313_v35 = vpop.f32.mrb[34].mxu0 }
 0x2f2   : > { %v1783_v36 = vpop.f32.mrb[35].mxu0 }
 0x2f6   : > { %1071 = vmax.xlane.f32.xlu1 %v1070_v37 }
 0x307   : > { %1080 = vrot.lane.b32.xlu1 %v2486_v23, %s2188_s13  ;;  %957 = vrot.lane.b32.xlu0 %v2483_v22, %s2189_s21  ;;  %s2629_s21 = scalar_lea.hbm %s2683_s4, %s1627_s8 }
 0x30b   : > { %1203 = vrot.lane.b32.xlu1 %v2489_v24, %s2190_s26  ;;  %s1447_s26 = scalar_lea.sflag [#allocation6], %s2440_s6 }
 0x30f   : > { %1326 = vrot.lane.b32.xlu1 %v2492_v25, %s2191_s14  ;;  %v717_v25 = vsel %vm474_vm4, %v712_v41, 0  ;;  %s2077_s14 = scalar_lea.vmem %s2631_s10, 128 }
 0x310   : > { %p2078_p11 = scmp.ne.s32.totalorder %s2631_s10, %s2077_s14 }
 0x312   : > { %p2079_p6 = pnand %p2078_p11, %p2385_p10 }
 0x314   : > { %p2080_p3 = pneg %p2079_p6 }
 0x34e   : > { %v580_v38 = vpop.xlane.xlu1 %579 }
 0x34f   : > { %v581_v39 = vsub.f32 %v2534_v55, %v580_v38 }
 0x351   : > { %v582_v40 = vmul.f32 1.442695, %v581_v39 }
 0x352   : > { %v835_v49 = vpop.permute.xlu1 %834 }
 0x353   : > { %1933 = vpow2.f32 %v582_v40  ;;  %v840_v54 = vsel %vm474_vm4, %v835_v49, 0 }
 0x356   : > { %v703_v42 = vpop.xlane.xlu0 %702 }
 0x357   : > { %v704_v43 = vsub.f32 %v2538_v60, %v703_v42 }
 0x359   : > { %v705_v44 = vmul.f32 1.442695, %v704_v43 }
 0x35b   : > { %1935 = vpow2.f32 %v705_v44 }
 0x35d   : > { %v1934_v23 = vpop.eup %1933 }
 0x35e   : > { %v826_v45 = vpop.xlane.xlu0 %825  ;;  %v584_v22 = vsel %vm455_vm5, %v1934_v23, 0.0  ;;  %v587_v46 = vpack.c.bf16 %v1934_v23, %v1934_v23 }
 0x35f   : > { %v827_v24 = vsub.f32 %v2542_v2, %v826_v45  ;;  %585 = vadd.xlane.f32.xlu1 %v584_v22 }
 0x360   : > { %1715 = vmatmul.mubr.msk.bf16.vlgmr.msra.gmra.mrb[8].mxu1 %vm455_vm5, %v587_v46 }
 0x361   : > { %v828_v47 = vmul.f32 1.442695, %v827_v24  ;;  %1725 = vmatpush3.bf16.msra.mxu1 %v717_v25  ;;  %1726 = vmatprep.mubr.msk.bf16.mxu1 %vm2176_vm0, %v2175_v0 }
 0x362   : > { %1736 = vmatprep.subr.bf16.mxu1 %v2175_v0 }
 0x363   : > { %1937 = vpow2.f32 %v828_v47 }
 0x365   : > { %v1936_v48 = vpop.eup %1935 }
 0x366   : > { %v949_v50 = vpop.xlane.xlu0 %948  ;;  %v707_v51 = vsel %vm455_vm5, %v1936_v48, 0.0  ;;  %v710_v52 = vpack.c.bf16 %v1936_v48, %v1936_v48 }
 0x367   : > { %v950_v53 = vsub.f32 %v2547_v8, %v949_v50  ;;  %708 = vadd.xlane.f32.xlu0 %v707_v51 }
 0x368   : > { %1727 = vmatmul.mubr.msk.bf16.vlgmr.msra.gmra.mrb[12].mxu1 %vm455_vm5, %v710_v52 }
 0x369   : > { %v951_v55 = vmul.f32 1.442695, %v950_v53  ;;  %1737 = vmatpush3.bf16.msra.mxu1 %v840_v54  ;;  %1738 = vmatprep.mubr.msk.bf16.mxu1 %vm2176_vm0, %v2175_v0 }
 0x36a   : > { %1748 = vmatprep.subr.bf16.mxu1 %v2175_v0 }
 0x36b   : > { %1939 = vpow2.f32 %v951_v55 }
 0x36d   : > { %v1938_v56 = vpop.eup %1937 }
 0x36e   : > { %v830_v57 = vsel %vm455_vm5, %v1938_v56, 0.0  ;;  %v833_v58 = vpack.c.bf16 %v1938_v56, %v1938_v56 }
 0x36f   : > { %831 = vadd.xlane.f32.xlu1 %v830_v57 }
 0x370   : > { %1739 = vmatmul.mubr.msk.bf16.vlgmr.msra.gmra.mrb[16].mxu1 %vm455_vm5, %v833_v58 }
 0x371   : > { %1750 = vmatprep.mubr.msk.bf16.mxu1 %vm2176_vm0, %v2175_v0 }
 0x375   : > { %v1940_v59 = vpop.eup %1939 }
 0x376   : > { %v1195_v60 = vpop.xlane.xlu0 %1194  ;;  %v953_v61 = vsel %vm455_vm5, %v1940_v59, 0.0  ;;  %v956_v8 = vpack.c.bf16 %v1940_v59, %v1940_v59 }
 0x377   : > { %v1196_v62 = vsub.f32 %v2553_v20, %v1195_v60  ;;  %954 = vadd.xlane.f32.xlu0 %v953_v61 }
 0x379   : > { %v1197_v63 = vmul.f32 1.442695, %v1196_v62 }
 0x37b   : > { %1941 = vpow2.f32 %v1197_v63 }
 0x37e   : > { %v1318_v1 = vpop.xlane.xlu0 %1317 }
 0x37f   : > { %v1319_v2 = vsub.f32 %v2566_v32, %v1318_v1 }
 0x381   : > { %v1320_v9 = vmul.f32 1.442695, %v1319_v2 }
 0x382   : > { %v958_v3 = vpop.permute.xlu0 %957 }
 0x383   : > { %v963_v4 = vsel %vm474_vm4, %v958_v3, 0  ;;  %v1072_v5 = vpop.xlane.xlu1 %1071 }
 0x384   : > { %v1073_v6 = vsub.f32 %v2551_v16, %v1072_v5  ;;  %1749 = vmatpush3.bf16.msra.mxu1 %v963_v4 }
 0x385   : > { %v1942_v7 = vpop.eup %1941  ;;  %1760 = vmatprep.subr.bf16.mxu1 %v2175_v0 }
 0x386   : > { %v1074_v10 = vmul.f32 1.442695, %v1073_v6  ;;  %v1199_v11 = vsel %vm455_vm5, %v1942_v7, 0.0  ;;  %v1202_v27 = vpack.c.bf16 %v1942_v7, %v1942_v7 }
 0x387   : > { %v1081_v12 = vpop.permute.xlu1 %1080  ;;  %1200 = vadd.xlane.f32.xlu0 %v1199_v11  ;;  %1751 = vmatmul.mubr.msk.bf16.vlgmr.msra.gmra.mrb[20].mxu1 %vm455_vm5, %v956_v8 }
 0x388   : > { %1943 = vpow2.f32 %v1074_v10  ;;  %v1086_v13 = vsel %vm474_vm4, %v1081_v12, 0  ;;  %1762 = vmatprep.mubr.msk.bf16.mxu1 %vm2176_vm0, %v2175_v0 }
 0x389   : > { %1761 = vmatpush3.bf16.msra.mxu1 %v1086_v13  ;;  %1945 = vpow2.f32 %v1320_v9 }
 0x38a   : > { %1772 = vmatprep.subr.bf16.mxu1 %v2175_v0 }
 0x38b   : > { %463 = vadd.xlane.f32.xlu0 %v462_v14  ;;  %v1204_v16 = vpop.permute.xlu1 %1203 }
 0x38c   : > { %v1209_v20 = vsel %vm474_vm4, %v1204_v16, 0 }
 0x38f   : > { %v1327_v26 = vpop.permute.xlu1 %1326 }
 0x390   : > { %v1332_v28 = vsel %vm474_vm4, %v1327_v26, 0 }
 0x392   : > { %v1944_v15 = vpop.eup %1943 }
 0x393   : > { %v1076_v17 = vsel %vm455_vm5, %v1944_v15, 0.0  ;;  %v1079_v18 = vpack.c.bf16 %v1944_v15, %v1944_v15  ;;  %v1946_v19 = vpop.eup %1945  ;;  %v1929_v15 = vld [vmem:[#allocation10] sm:$0xff]  }
 0x394   : > { %1077 = vadd.xlane.f32.xlu1 %v1076_v17  ;;  %v1322_v21 = vsel %vm455_vm5, %v1946_v19, 0.0  ;;  %v1325_v29 = vpack.c.bf16 %v1946_v19, %v1946_v19  ;;  %1791 = vmatpush3.bf16.msra.mxu0 %v1929_v15  ;;  %v1930_v19 = vld [vmem:[#allocation10 + $0x8] sm:$0xff]  }
 0x395   : > { %1763 = vmatmul.mubr.msk.bf16.vlgmr.msra.gmra.mrb[24].mxu1 %vm455_vm5, %v1079_v18  ;;  %1792 = vmatprep.subr.bf16.mxu0 %v2175_v0 }
 0x396   : > { %1773 = vmatpush3.bf16.msra.mxu1 %v1209_v20  ;;  %1774 = vmatprep.mubr.msk.bf16.mxu1 %vm2176_vm0, %v2175_v0 }
 0x397   : > { %1784 = vmatprep.subr.bf16.mxu1 %v2175_v0 }
 0x398   : > { %1323 = vadd.xlane.f32.xlu1 %v1322_v21  ;;  %1793 = vmatpush3.bf16.msra.mxu0 %v1930_v19 }
 0x39d   : > { %1775 = vmatmul.mubr.msk.bf16.vlgmr.msra.gmra.mrb[28].mxu1 %vm455_vm5, %v1202_v27 }
 0x39e   : > { %1785 = vmatpush3.bf16.msra.mxu1 %v1332_v28  ;;  %1786 = vmatprep.mubr.msk.bf16.mxu1 %vm2176_vm0, %v2175_v0 }
 0x3a5   : > { %1787 = vmatmul.mubr.msk.bf16.vlgmr.msra.gmra.mrb[32].mxu1 %vm455_vm5, %v1325_v29 }
 0x3be   : > { %v512_v30 = vpop.f32.mrb[4].mxu1 }
 0x3bf   : > { %v1704_v31 = vpop.f32.mrb[5].mxu1 }
 0x3c0   : > { %v515_v32 = vpop.f32.mrb[6].mxu1 }
 0x3c1   : > { %v1705_v33 = vpop.f32.mrb[7].mxu1 }
 0x3ec   : > { %v586_v40 = vpop.xlane.xlu1 %585 }
 0x3f4   : > { %v709_v34 = vpop.xlane.xlu0 %708 }
 0x3fc   : > { %v832_v22 = vpop.xlane.xlu1 %831 }
 0x404   : > { %v955_v35 = vpop.xlane.xlu0 %954 }
 0x414   : > { %v1201_v36 = vpop.xlane.xlu0 %1200 }
 0x418   : > { %v464_v37 = vpop.xlane.xlu0 %463 }
 0x419   : > { %1947 = vrcp.f32 %v464_v37 }
 0x41a   : > { %1949 = vrcp.f32 %v586_v40 }
 0x41b   : > { %1951 = vrcp.f32 %v709_v34 }
 0x41c   : > { %1953 = vrcp.f32 %v832_v22 }
 0x41d   : > { %1955 = vrcp.f32 %v955_v35 }
 0x421   : > { %v1078_v62 = vpop.xlane.xlu1 %1077 }
 0x422   : > { %1957 = vrcp.f32 %v1078_v62 }
 0x423   : > { %v1948_v38 = vpop.eup %1947  ;;  %1959 = vrcp.f32 %v1201_v36 }
 0x424   : > { %v519_v39 = vmul.f32 %v1948_v38, %v512_v30  ;;  %v1950_v42 = vpop.eup %1949 }
 0x425   : > { %v1952_v25 = vpop.eup %1951  ;;  %v1324_v10 = vpop.xlane.xlu1 %1323 }
 0x426   : > { %v520_v41 = vpack.c.bf16 %v519_v39, %v519_v39  ;;  %v1954_v53 = vpop.eup %1953  ;;  %1961 = vrcp.f32 %v1324_v10 }
 0x427   : > { %v1956_v60 = vpop.eup %1955 }
 0x428   : > { %522 = vst.msk [vmem:[#allocation3] sm:$0xf] %vm521_vm6, %v520_v41 }
 0x42c   : > { %v1958_v5 = vpop.eup %1957 }
 0x42d   : > { %v1960_v13 = vpop.eup %1959 }
 0x430   : > { %v1962_v26 = vpop.eup %1961 }
 0x433   : > { %v630_v43 = vpop.f32.mrb[8].mxu1 }
 0x434   : > { %v637_v44 = vmul.f32 %v1950_v42, %v630_v43  ;;  %v1716_v23 = vpop.f32.mrb[9].mxu1 }
 0x435   : > { %v633_v45 = vpop.f32.mrb[10].mxu1 }
 0x436   : > { %v1630_v46 = vpack.c.bf16 %v637_v44, %v637_v44  ;;  %v1717_v24 = vpop.f32.mrb[11].mxu1 }
 0x438   : > { %642 = vrot.lane.b32.xlu1 %v1630_v46, %s2192_s11  ;;  %s2081_s11 = sshll.u32 %s2199_s18, 4  ;;  %s2082_s11 = int_to_ptr.vmem [resolvable:$false] %s2081_s11 }
 0x439   : > { %p2084_p5 = scmp.lt.s32.totalorder %s2631_s10, %s2082_s11 }
 0x43b   : > { %v753_v47 = vpop.f32.mrb[12].mxu1 }
 0x43c   : > { %v760_v48 = vmul.f32 %v1952_v25, %v753_v47  ;;  %v1728_v49 = vpop.f32.mrb[13].mxu1 }
 0x43d   : > { %v756_v50 = vpop.f32.mrb[14].mxu1 }
 0x43e   : > { %v1631_v51 = vpack.c.bf16 %v760_v48, %v760_v48  ;;  %v1729_v52 = vpop.f32.mrb[15].mxu1 }
 0x440   : > { %765 = vrot.lane.b32.xlu0 %v1631_v51, %s2193_s23  ;;  %s2083_s23 = scalar_lea.vmem %s2082_s11, 256 }
 0x441   : > { %p2085_p7 = scmp.lt.s32.totalorder %s2083_s23, %s2077_s14 }
 0x443   : > { %v876_v54 = vpop.f32.mrb[16].mxu1  ;;  %p2086_p9 = por %p2085_p7, %p2084_p5 }
 0x444   : > { %v883_v55 = vmul.f32 %v1954_v53, %v876_v54  ;;  %v1740_v56 = vpop.f32.mrb[17].mxu1 }
 0x445   : > { %v879_v57 = vpop.f32.mrb[18].mxu1  ;;  %p2087_p0 = pnand %p2086_p9, %p2080_p3 }
 0x446   : > { %v1632_v58 = vpack.c.bf16 %v883_v55, %v883_v55  ;;  %v1741_v59 = vpop.f32.mrb[19].mxu1 }
 0x448   : > { %888 = vrot.lane.b32.xlu1 %v1632_v58, %s2194_s25 }
 0x45a   : > { %v999_v61 = vpop.f32.mrb[20].mxu1 }
 0x45b   : > { %v1006_v63 = vmul.f32 %v1956_v60, %v999_v61  ;;  %v1752_v1 = vpop.f32.mrb[21].mxu1 }
 0x45c   : > { %v1002_v2 = vpop.f32.mrb[22].mxu1 }
 0x45d   : > { %v1633_v3 = vpack.c.bf16 %v1006_v63, %v1006_v63  ;;  %v1753_v4 = vpop.f32.mrb[23].mxu1 }
 0x45f   : > { %1011 = vrot.lane.b32.xlu1 %v1633_v3, %s2195_s27 }
 0x468   : > { %v1122_v6 = vpop.f32.mrb[24].mxu1 }
 0x469   : > { %v1129_v7 = vmul.f32 %v1958_v5, %v1122_v6  ;;  %v1764_v8 = vpop.f32.mrb[25].mxu1 }
 0x46a   : > { %v1125_v9 = vpop.f32.mrb[26].mxu1 }
 0x46b   : > { %v1634_v11 = vpack.c.bf16 %v1129_v7, %v1129_v7  ;;  %v1765_v12 = vpop.f32.mrb[27].mxu1 }
 0x46d   : > { %1134 = vrot.lane.b32.xlu0 %v1634_v11, %s2196_s24 }
 0x470   : > { %v1245_v14 = vpop.f32.mrb[28].mxu1 }
 0x471   : > { %v1252_v16 = vmul.f32 %v1960_v13, %v1245_v14  ;;  %v1776_v17 = vpop.f32.mrb[29].mxu1 }
 0x472   : > { %v1248_v18 = vpop.f32.mrb[30].mxu1 }
 0x473   : > { %v1635_v20 = vpack.c.bf16 %v1252_v16, %v1252_v16  ;;  %v1777_v21 = vpop.f32.mrb[31].mxu1 }
 0x475   : > { %1257 = vrot.lane.b32.xlu1 %v1635_v20, %s2197_s22 }
 0x478   : > { %v1368_v27 = vpop.f32.mrb[32].mxu1 }
 0x479   : > { %v1375_v28 = vmul.f32 %v1962_v26, %v1368_v27  ;;  %v1788_v29 = vpop.f32.mrb[33].mxu1 }
 0x47a   : > { %v1371_v30 = vpop.f32.mrb[34].mxu1 }
 0x47b   : > { %v1636_v31 = vpack.c.bf16 %v1375_v28, %v1375_v28  ;;  %v1789_v32 = vpop.f32.mrb[35].mxu1 }
 0x47d   : > { %1380 = vrot.lane.b32.xlu0 %v1636_v31, %s2198_s28 }
 0x4aa   : > { %v643_v33 = vpop.permute.xlu1 %642 }
 0x4ab   : > { %646 = vst.msk [vmem:[#allocation3] sm:$0xf] %vm645_vm7, %v643_v33 }
 0x4b2   : > { %v766_v34 = vpop.permute.xlu0 %765 }
 0x4b3   : > { %769 = vst.msk [vmem:[#allocation3] sm:$0xf] %vm768_vm8, %v766_v34 }
 0x4ba   : > { %v889_v0 = vpop.permute.xlu1 %888 }
 0x4bb   : > { %892 = vst.msk [vmem:[#allocation3] sm:$0xf] %vm891_vm9, %v889_v0 }
 0x4d1   : > { %v1012_v35 = vpop.permute.xlu1 %1011 }
 0x4d2   : > { %1015 = vst.msk [vmem:[#allocation3] sm:$0xf] %vm1014_vm10, %v1012_v35 }
 0x4df   : > { %v1135_v36 = vpop.permute.xlu0 %1134 }
 0x4e0   : > { %1138 = vst.msk [vmem:[#allocation3] sm:$0xf] %vm1137_vm11, %v1135_v36 }
 0x4e7   : > { %v1258_v37 = vpop.permute.xlu1 %1257 }
 0x4e8   : > { %1261 = vst.msk [vmem:[#allocation3] sm:$0xf] %vm1260_vm12, %v1258_v37 }
 0x4ef   : > { %v1381_v38 = vpop.permute.xlu0 %1380 }
 0x4f0   : > { %1384 = vst.msk [vmem:[#allocation3] sm:$0xf] %vm1383_vm13, %v1381_v38 }
 0x4f7   : > { %v1385_v39 = vld [vmem:[#allocation3] sm:$0xf] }
 0x4f8   : > { %1795 = vmatmul.mubr.msk.bf16.vlgmr.msra.gmra.mrb[36].mxu0 %vm293_vm1, %v1385_v39 }
 0x5cb   : > { %v1439_v40 = vpop.f32.mrb[36].mxu0 }
 0x5cc   : > { %1445 = vst.msk [vmem:[%s270_s5] sm:$0xff] %vm293_vm1, %v1439_v40  ;;  %v1796_v41 = vpop.f32.mrb[37].mxu0 }
 0x5cd   : > { %v1442_v42 = vpop.f32.mrb[38].mxu0 }
 0x5ce   : > { %2090 = shalt.err (!%p2087_p0)
}
 0x5cf   : > { %s2091_s6 = scalar_lea.hbm %s2629_s21, 128  ;;  %s2095_s24 = scalar_lea.hbm %s2683_s4, 256 }
 0x5d0   : > { %p2092_p4 = scmp.ne.s32.totalorder %s2629_s21, %s2091_s6  ;;  %p2096_p1 = scmp.lt.u32.totalorder %s2629_s21, %s2683_s4 }
 0x5d1   : > { %p2097_p12 = scmp.lt.u32.totalorder %s2095_s24, %s2091_s6  ;;  %p2099_p11 = scmp.lt.u32.totalorder %s2091_s6, %s2629_s21 }
 0x5d2   : > { %p2093_p2 = pnand %p2092_p4, %p2385_p10 }
 0x5d3   : > { %p2098_p13 = por %p2097_p12, %p2096_p1 }
 0x5d4   : > { %p2094_p8 = pneg %p2093_p2 }
 0x5d5   : > { %p2100_p6 = por %p2099_p11, %p2098_p13 }
 0x5d7   : > { %p2101_p3 = pnand %p2100_p6, %p2094_p8 }
 0x5d9   : > { %2104 = shalt.err (!%p2101_p3)
}
 0x5da   : > { %1812 = dma.vmem_to_hbm [thread:$0]  (%p2385_p10), %s2631_s10, 128, %s2629_s21, %s1447_s26   ;;  %v1797_v43 = vpop.f32.mrb[39].mxu0 }
 0x5db PF: > { %s2703_s29 = sld [smem:[#allocation17_spill]]  ;;  %s1473_s8 = sand.u32 1, %s2147_s15  }
 0x5dc   : > { %p2705_p7 = scmp.ge.s32.totalorder %s2167_s20, 2  ;;  %s1474_s5 = scalar_lea.sflag [#allocation6], %s1473_s8 }
 0x5e1   : > { %p2704_p5 = scmp.ne.s32.totalorder %s2703_s29, 0 }
 0x5e3   : > { %p1829_p9 = pnand %p2705_p7, %p2704_p5 }
 0x5e5   : > { %2142 = dma.done.wait (!%p1829_p9), %s1474_s5, 128  }
 0x5e6   : > { %2144 = vsyncadd (!%p1829_p9), %s1474_s5, 4294967168  ;;  %s22_s20 = sadd.s32 1, %s2167_s20   ;;  %s2706_s15 = smov %s2151_s16 }
 0x5e7   : > { %p19_p0 = scmp.ge.s32.totalorder %s22_s20, 4   ;;  %s2707_s16 = smov %s2155_s17 }
 0x5e8   : > { %s2708_s17 = smov %s2397_s7  ;;  %s2709_s18 = smov %s2163_s19 }
 0x5e9   : > { %s2710_s19 = smov %s2712_s30  ;;  %21 = sbr.rel (!%p19_p0) target bundleno = 8 (0x8), region = 98 }
 0x5f0   :  { %1479 = vsyncpa [#allocation5], 1 }
 0x5f1   :  { %1481 = vsyncpa [#allocation5 + $0x1], 1 }
 0x5f2   :  { %1482 = vsyncpa [#allocation8], 1 }
 0x5f3   :  { %1483 = vsyncpa [#allocation11], 1 }
 0x5f4   :  { %1484 = vsyncpa [#allocation6], 1 }
 0x5f5   :  { %1486 = vsyncpa [#allocation6 + $0x1], 1 }

</bundles_post_ra>
